<compile_context>
chip_gen: v7x
topology: tpu7x:2x2x1
jax: 0.10.0
libtpu: 0.0.40
codegen_flags: <defaults>
</compile_context>

<pallas_src>
import functools

import jax
import jax.numpy as jnp
from jax.experimental import pallas as pl
from jax.experimental.pallas import tpu as pltpu

PADDING_IDX = 0
_NEG_INF = -1e30     # stand-in for -inf that keeps exp() finite


# --------------------------- fused Pallas kernel ---------------------------

def _rnn_attention_kernel(padding_idx, S, B,
                          ids_ref, table_ref,
                          wi_ref, wh_ref, bi_ref, bh_ref,
                          wa1_ref, ba1_ref, wa2_ref, ba2_ref,
                          wp_ref, bp_ref,
                          o_ref,
                          out_s):
    """Fused: embedding -> GRU over time -> attention over time -> Linear + LogSoftmax."""
    voc = table_ref.shape[0]
    H = wh_ref.shape[0]
    f32 = jnp.float32

    def dot(a, b):
        return jnp.dot(a, b, preferred_element_type=f32)

    ids = ids_ref[...]                                        # (S*B, 1) int32
    pad_all = ids == padding_idx                              # (S*B, 1) bool

    # ---- time-independent work, batched over all S*B rows (single MXU pushes) ----
    # Embedding gather as one-hot @ table (rides the MXU, no dynamic gather).
    onehot = (ids == jax.lax.broadcasted_iota(jnp.int32, (S * B, voc), 1)).astype(f32)
    x_all = dot(onehot, table_ref[...])                       # (S*B, E)
    # Input-gate pre-activations for every timestep: x @ W_ih^T + b_ih, gates [r|z|n].
    gi_all = dot(x_all, wi_ref[...]) + bi_ref[...]            # (S*B, 3H)

    # ---- sequential GRU recurrence (only the h-dependent matmul is in the loop) ----
    h = jnp.zeros((B, H), f32)                                # h0 = 0
    for t in range(S):                                        # S is small & static
        lo, hi = t * B, (t + 1) * B
        gi_t = gi_all[lo:hi]                                  # (B, 3H)
        pad_t = pad_all[lo:hi]                                # (B, 1)
        gh = dot(h, wh_ref[...]) + bh_ref[...]                # (B, 3H) = h @ W_hh^T + b_hh
        r = jax.nn.sigmoid(gi_t[:, 0:H] + gh[:, 0:H])
        z = jax.nn.sigmoid(gi_t[:, H:2 * H] + gh[:, H:2 * H])
        n = jnp.tanh(gi_t[:, 2 * H:3 * H] + r * gh[:, 2 * H:3 * H])
        h_new = (1.0 - z) * n + z * h
        # packed-sequence semantics: padded steps neither advance h nor emit output.
        h = jnp.where(pad_t, h, h_new)
        out_s[lo:hi, :] = jnp.where(pad_t, 0.0, h)            # pad_packed_sequence zero-fill

    # ---- attention generator on ALL timesteps at once: Linear -> tanh -> Linear ----
    outs = out_s[...]                                         # (S*B, H)
    g = jnp.tanh(dot(outs, wa1_ref[...]) + ba1_ref[...])      # (S*B, H)
    score = dot(g, wa2_ref[...]) + ba2_ref[...]               # (S*B, 1)
    score = jnp.where(pad_all, _NEG_INF, score)               # masked_fill(-inf)

    # softmax over time (dim 0) per batch element + weighted sum of GRU outputs.
    m = score[0:B]
    for t in range(1, S):
        m = jnp.maximum(m, score[t * B:(t + 1) * B])
    denom = jnp.zeros((B, 1), f32)
    acc = jnp.zeros((B, H), f32)
    for t in range(S):
        e_t = jnp.exp(score[t * B:(t + 1) * B] - m)           # (B, 1); pads underflow to 0
        denom = denom + e_t
        acc = acc + outs[t * B:(t + 1) * B] * e_t             # lane-broadcast scalar weight
    hidden = acc * pl.reciprocal(denom, approx=True)          # == (outputs * softmax(a)).sum(0)

    # toProbs: Linear(H, nclasses) + LogSoftmax (last axis)
    logits = dot(hidden, wp_ref[...]) + bp_ref[...]           # (B, C)
    lmax = jnp.max(logits, axis=-1, keepdims=True)
    lse = jnp.log(jnp.sum(jnp.exp(logits - lmax), axis=-1, keepdims=True)) + lmax
    o_ref[...] = logits - lse


# --------------------------- wrapper ---------------------------

def rnn_attention_pallas(params, inputs, padding_idx=PADDING_IDX):
    """RNNAtteion.forward. inputs: (seq_len, bsz) int32 token ids."""
    S, B = inputs.shape
    H = params["w_hh"].shape[1]
    C = params["wp"].shape[0]

    # One-time layout plumbing: transpose every weight to (in_features, out_features) so
    # all in-kernel contractions are plain ((1,),(0,)) MXU pushes; keep GRU gates fused
    # as one (in, 3H) matrix each for x and h (gate order r|z|n, PyTorch layout).
    wi = params["w_ih"].T                                     # (E, 3H)
    wh = params["w_hh"].T                                     # (H, 3H)
    bi = params["b_ih"].reshape(1, 3 * H)
    bh = params["b_hh"].reshape(1, 3 * H)
    wa1, ba1 = params["wa1"].T, params["ba1"].reshape(1, H)
    wa2, ba2 = params["wa2"].T, params["ba2"].reshape(1, 1)
    wp, bp = params["wp"].T, params["bp"].reshape(1, C)

    ids2 = inputs.astype(jnp.int32).reshape(S * B, 1)         # row t*B+b == inputs[t, b]

    vmem = pl.BlockSpec(memory_space=pltpu.MemorySpace.VMEM)
    return pl.pallas_call(
        functools.partial(_rnn_attention_kernel, padding_idx, S, B),
        out_shape=jax.ShapeDtypeStruct((B, C), jnp.float32),
        in_specs=[vmem] * 12,
        out_specs=vmem,
        scratch_shapes=[
            pltpu.VMEM((S * B, H), jnp.float32),              # GRU outputs, all timesteps
        ],
    )(ids2, params["emb"], wi, wh, bi, bh, wa1, ba1, wa2, ba2, wp, bp)


# --------------------------- pure-JAX reference (for the self-check) ---------------------------

def rnn_attention_ref(params, inputs, padding_idx=PADDING_IDX):
    S, B = inputs.shape
    H = params["w_hh"].shape[1]
    embs = params["emb"][inputs]                   # (S, B, E)
    mask = inputs == padding_idx                   # (S, B)
    w_ih, w_hh = params["w_ih"], params["w_hh"]
    b_ih, b_hh = params["b_ih"], params["b_hh"]

    def cell(h, xm):
        x, m = xm
        gi = x @ w_ih.T + b_ih
        gh = h @ w_hh.T + b_hh
        i_r, i_z, i_n = jnp.split(gi, 3, axis=-1)
        h_r, h_z, h_n = jnp.split(gh, 3, axis=-1)
        r = jax.nn.sigmoid(i_r + h_r)
        z = jax.nn.sigmoid(i_z + h_z)
        n = jnp.tanh(i_n + r * h_n)
        h_new = (1.0 - z) * n + z * h
        h_out = jnp.where(m[:, None], h, h_new)
        return h_out, jnp.where(m[:, None], 0.0, h_out)

    _, outs = jax.lax.scan(cell, jnp.zeros((B, H), jnp.float32), (embs, mask))
    a_raw = jnp.tanh(outs @ params["wa1"].T + params["ba1"]) @ params["wa2"].T + params["ba2"]
    a_raw = jnp.where(mask[:, :, None], _NEG_INF, a_raw)
    a = jax.nn.softmax(a_raw, axis=0)
    hidden = jnp.sum(outs * a, axis=0)
    logits = hidden @ params["wp"].T + params["bp"]
    return jax.nn.log_softmax(logits, axis=-1)


# --------------------------- main ---------------------------

if __name__ == "__main__":
    key = jax.random.PRNGKey(0)
    ks = jax.random.split(key, 12)

    VOC, EDIM, HDIM, NCLASSES = 50, 16, 32, 8      # voc_size, edim, hdim, nclasses
    SEQ, BSZ = 10, 4                               # seq_len, bsz
    DROPOUT = 0.0                                  # single-layer GRU -> dropout is a no-op

    def uni(k, shape, fan_in):
        bnd = 1.0 / (fan_in ** 0.5)
        return jax.random.uniform(k, shape, jnp.float32, -bnd, bnd)

    emb_w = jax.random.normal(ks[0], (VOC, EDIM), jnp.float32)
    emb_w = emb_w.at[PADDING_IDX].set(0.0)         # nn.Embedding(padding_idx=...) zero row

    params = {
        "emb": emb_w,
        # nn.GRU params, PyTorch layout/init U(-1/sqrt(H), 1/sqrt(H)), gate order (r|z|n)
        "w_ih": uni(ks[1], (3 * HDIM, EDIM), HDIM),
        "w_hh": uni(ks[2], (3 * HDIM, HDIM), HDIM),
        "b_ih": uni(ks[3], (3 * HDIM,), HDIM),
        "b_hh": uni(ks[4], (3 * HDIM,), HDIM),
        # Attention.generator = Linear(H,H) -> Tanh -> Linear(H,1)
        "wa1": uni(ks[5], (HDIM, HDIM), HDIM),
        "ba1": uni(ks[6], (HDIM,), HDIM),
        "wa2": uni(ks[7], (1, HDIM), HDIM),
        "ba2": uni(ks[8], (1,), HDIM),
        # toProbs = Linear(H, nclasses) -> LogSoftmax
        "wp": uni(ks[9], (NCLASSES, HDIM), HDIM),
        "bp": uni(ks[10], (NCLASSES,), HDIM),
    }

    # Token ids with trailing padding, lengths sorted descending
    # (pack_padded_sequence(enforce_sorted=True) requirement; longest == seq_len).
    lengths = jnp.array([SEQ, 8, 7, 5], dtype=jnp.int32)
    toks = jax.random.randint(ks[11], (SEQ, BSZ), 1, VOC, dtype=jnp.int32)
    t_idx = jnp.arange(SEQ, dtype=jnp.int32)[:, None]
    inputs = jnp.where(t_idx < lengths[None, :], toks, PADDING_IDX)   # (SEQ, BSZ)

    out = jax.block_until_ready(jax.jit(rnn_attention_pallas)(params, inputs))

    assert out.shape == (BSZ, NCLASSES) and out.dtype == jnp.float32
    assert bool(jnp.all(jnp.isfinite(out)))
    # rows must be valid log-probabilities (LogSoftmax output)
    assert bool(jnp.allclose(jnp.sum(jnp.exp(out), axis=-1), 1.0, atol=1e-3))
    # cross-check against the pure-JAX reference (loose tol: MXU f32 matmul passes)
    ref = rnn_attention_ref(params, inputs)
    assert bool(jnp.allclose(out, ref, atol=5e-2, rtol=5e-2))
    print("KERNEL_OK")
</pallas_src>

<mosaic_0001>
module attributes {stable_mosaic.version = 11 : i64} {
  func.func @_rnn_attention_kernel(%arg0: memref<40x1xi32, #tpu.memory_space<vmem>>, %arg1: memref<50x16xf32, #tpu.memory_space<vmem>>, %arg2: memref<16x96xf32, #tpu.memory_space<vmem>>, %arg3: memref<32x96xf32, #tpu.memory_space<vmem>>, %arg4: memref<1x96xf32, #tpu.memory_space<vmem>>, %arg5: memref<1x96xf32, #tpu.memory_space<vmem>>, %arg6: memref<32x32xf32, #tpu.memory_space<vmem>>, %arg7: memref<1x32xf32, #tpu.memory_space<vmem>>, %arg8: memref<32x1xf32, #tpu.memory_space<vmem>>, %arg9: memref<1x1xf32, #tpu.memory_space<vmem>>, %arg10: memref<32x8xf32, #tpu.memory_space<vmem>>, %arg11: memref<1x8xf32, #tpu.memory_space<vmem>>, %arg12: memref<4x8xf32, #tpu.memory_space<vmem>>, %arg13: memref<40x32xf32, #tpu.memory_space<vmem>>) attributes {dimension_semantics = [], scalar_prefetch = 0 : i64, scratch_operands = 1 : i64, tpu.core_type = #tpu.core_type<tc>} {
    %c0 = arith.constant 0 : index
    %c0_0 = arith.constant 0 : index
    %0 = vector.load %arg0[%c0, %c0_0] : memref<40x1xi32, #tpu.memory_space<vmem>>, vector<40x1xi32>
    %c0_i32 = arith.constant 0 : i32
    %1 = vector.broadcast %c0_i32 : i32 to vector<40x1xi32>
    %2 = arith.cmpi eq, %0, %1 : vector<40x1xi32>
    %3 = tpu.iota {dimensions = array<i32: 1>} : vector<40x50xi32>
    %4 = vector.broadcast %0 : vector<40x1xi32> to vector<40x50xi32>
    %5 = arith.cmpi eq, %4, %3 : vector<40x50xi32>
    %6 = arith.extui %5 : vector<40x50xi1> to vector<40x50xi32>
    %7 = arith.sitofp %6 : vector<40x50xi32> to vector<40x50xf32>
    %c0_1 = arith.constant 0 : index
    %c0_2 = arith.constant 0 : index
    %8 = vector.load %arg1[%c0_1, %c0_2] : memref<50x16xf32, #tpu.memory_space<vmem>>, vector<50x16xf32>
    %cst = arith.constant dense<0.000000e+00> : vector<40x16xf32>
    %9 = tpu.matmul %7, %8, %cst {dimension_numbers = #tpu.dot_dimension_numbers<[1], [0], [0], [1], [0, 0, 1, 1], [], []>} : vector<40x50xf32>, vector<50x16xf32>, vector<40x16xf32> -> vector<40x16xf32>
    %c0_3 = arith.constant 0 : index
    %c0_4 = arith.constant 0 : index
    %10 = vector.load %arg2[%c0_3, %c0_4] : memref<16x96xf32, #tpu.memory_space<vmem>>, vector<16x96xf32>
    %cst_5 = arith.constant dense<0.000000e+00> : vector<40x96xf32>
    %11 = tpu.matmul %9, %10, %cst_5 {dimension_numbers = #tpu.dot_dimension_numbers<[1], [0], [0], [1], [0, 0, 1, 1], [], []>} : vector<40x16xf32>, vector<16x96xf32>, vector<40x96xf32> -> vector<40x96xf32>
    %c0_6 = arith.constant 0 : index
    %c0_7 = arith.constant 0 : index
    %12 = vector.load %arg4[%c0_6, %c0_7] : memref<1x96xf32, #tpu.memory_space<vmem>>, vector<1x96xf32>
    %13 = vector.broadcast %12 : vector<1x96xf32> to vector<40x96xf32>
    %14 = arith.addf %11, %13 : vector<40x96xf32>
    %cst_8 = arith.constant 0.000000e+00 : f32
    %15 = vector.broadcast %cst_8 : f32 to vector<4x32xf32>
    %16 = vector.extract_strided_slice %14 {offsets = [0, 0], sizes = [4, 96], strides = [1, 1]} : vector<40x96xf32> to vector<4x96xf32>
    %17 = vector.extract_strided_slice %2 {offsets = [0, 0], sizes = [4, 1], strides = [1, 1]} : vector<40x1xi1> to vector<4x1xi1>
    %c0_9 = arith.constant 0 : index
    %c0_10 = arith.constant 0 : index
    %18 = vector.load %arg3[%c0_9, %c0_10] : memref<32x96xf32, #tpu.memory_space<vmem>>, vector<32x96xf32>
    %cst_11 = arith.constant dense<0.000000e+00> : vector<4x96xf32>
    %19 = tpu.matmul %15, %18, %cst_11 {dimension_numbers = #tpu.dot_dimension_numbers<[1], [0], [0], [1], [0, 0, 1, 1], [], []>} : vector<4x32xf32>, vector<32x96xf32>, vector<4x96xf32> -> vector<4x96xf32>
    %c0_12 = arith.constant 0 : index
    %c0_13 = arith.constant 0 : index
    %20 = vector.load %arg5[%c0_12, %c0_13] : memref<1x96xf32, #tpu.memory_space<vmem>>, vector<1x96xf32>
    %21 = vector.broadcast %20 : vector<1x96xf32> to vector<4x96xf32>
    %22 = arith.addf %19, %21 : vector<4x96xf32>
    %23 = vector.extract_strided_slice %16 {offsets = [0, 0], sizes = [4, 32], strides = [1, 1]} : vector<4x96xf32> to vector<4x32xf32>
    %24 = vector.extract_strided_slice %22 {offsets = [0, 0], sizes = [4, 32], strides = [1, 1]} : vector<4x96xf32> to vector<4x32xf32>
    %25 = arith.addf %23, %24 : vector<4x32xf32>
    %26 = arith.negf %25 : vector<4x32xf32>
    %27 = math.exp %26 : vector<4x32xf32>
    %cst_14 = arith.constant 1.000000e+00 : f32
    %28 = vector.broadcast %cst_14 : f32 to vector<4x32xf32>
    %29 = arith.addf %28, %27 : vector<4x32xf32>
    %30 = arith.divf %28, %29 : vector<4x32xf32>
    %31 = vector.extract_strided_slice %16 {offsets = [0, 32], sizes = [4, 32], strides = [1, 1]} : vector<4x96xf32> to vector<4x32xf32>
    %32 = vector.extract_strided_slice %22 {offsets = [0, 32], sizes = [4, 32], strides = [1, 1]} : vector<4x96xf32> to vector<4x32xf32>
    %33 = arith.addf %31, %32 : vector<4x32xf32>
    %34 = arith.negf %33 : vector<4x32xf32>
    %35 = math.exp %34 : vector<4x32xf32>
    %cst_15 = arith.constant 1.000000e+00 : f32
    %36 = vector.broadcast %cst_15 : f32 to vector<4x32xf32>
    %37 = arith.addf %36, %35 : vector<4x32xf32>
    %38 = arith.divf %36, %37 : vector<4x32xf32>
    %39 = vector.extract_strided_slice %16 {offsets = [0, 64], sizes = [4, 32], strides = [1, 1]} : vector<4x96xf32> to vector<4x32xf32>
    %40 = vector.extract_strided_slice %22 {offsets = [0, 64], sizes = [4, 32], strides = [1, 1]} : vector<4x96xf32> to vector<4x32xf32>
    %41 = arith.mulf %30, %40 : vector<4x32xf32>
    %42 = arith.addf %39, %41 : vector<4x32xf32>
    %43 = math.tanh %42 : vector<4x32xf32>
    %cst_16 = arith.constant 1.000000e+00 : f32
    %44 = vector.broadcast %cst_16 : f32 to vector<4x32xf32>
    %45 = arith.subf %44, %38 : vector<4x32xf32>
    %46 = arith.mulf %45, %43 : vector<4x32xf32>
    %47 = arith.mulf %38, %15 : vector<4x32xf32>
    %48 = arith.addf %46, %47 : vector<4x32xf32>
    %49 = vector.shape_cast %17 : vector<4x1xi1> to vector<4x1xi1>
    %50 = vector.broadcast %49 : vector<4x1xi1> to vector<4x32xi1>
    %51 = arith.select %50, %15, %48 : vector<4x32xi1>, vector<4x32xf32>
    %cst_17 = arith.constant 0.000000e+00 : f32
    %52 = vector.shape_cast %17 : vector<4x1xi1> to vector<4x1xi1>
    %53 = vector.broadcast %52 : vector<4x1xi1> to vector<4x32xi1>
    %54 = vector.broadcast %cst_17 : f32 to vector<4x32xf32>
    %55 = arith.select %53, %54, %51 : vector<4x32xi1>, vector<4x32xf32>
    %c0_18 = arith.constant 0 : index
    %c0_19 = arith.constant 0 : index
    %56 = vector.load %arg13[%c0_18, %c0_19] : memref<40x32xf32, #tpu.memory_space<vmem>>, vector<4x32xf32>
    tpu.vector_store %arg13[%c0_18, %c0_19], %55 {strides = array<i32>} : memref<40x32xf32, #tpu.memory_space<vmem>>, vector<4x32xf32>,
    %57 = vector.extract_strided_slice %14 {offsets = [4, 0], sizes = [4, 96], strides = [1, 1]} : vector<40x96xf32> to vector<4x96xf32>
    %58 = vector.extract_strided_slice %2 {offsets = [4, 0], sizes = [4, 1], strides = [1, 1]} : vector<40x1xi1> to vector<4x1xi1>
    %c0_20 = arith.constant 0 : index
    %c0_21 = arith.constant 0 : index
    %59 = vector.load %arg3[%c0_20, %c0_21] : memref<32x96xf32, #tpu.memory_space<vmem>>, vector<32x96xf32>
    %cst_22 = arith.constant dense<0.000000e+00> : vector<4x96xf32>
    %60 = tpu.matmul %51, %59, %cst_22 {dimension_numbers = #tpu.dot_dimension_numbers<[1], [0], [0], [1], [0, 0, 1, 1], [], []>} : vector<4x32xf32>, vector<32x96xf32>, vector<4x96xf32> -> vector<4x96xf32>
    %c0_23 = arith.constant 0 : index
    %c0_24 = arith.constant 0 : index
    %61 = vector.load %arg5[%c0_23, %c0_24] : memref<1x96xf32, #tpu.memory_space<vmem>>, vector<1x96xf32>
    %62 = vector.broadcast %61 : vector<1x96xf32> to vector<4x96xf32>
    %63 = arith.addf %60, %62 : vector<4x96xf32>
    %64 = vector.extract_strided_slice %57 {offsets = [0, 0], sizes = [4, 32], strides = [1, 1]} : vector<4x96xf32> to vector<4x32xf32>
    %65 = vector.extract_strided_slice %63 {offsets = [0, 0], sizes = [4, 32], strides = [1, 1]} : vector<4x96xf32> to vector<4x32xf32>
    %66 = arith.addf %64, %65 : vector<4x32xf32>
    %67 = arith.negf %66 : vector<4x32xf32>
    %68 = math.exp %67 : vector<4x32xf32>
    %cst_25 = arith.constant 1.000000e+00 : f32
    %69 = vector.broadcast %cst_25 : f32 to vector<4x32xf32>
    %70 = arith.addf %69, %68 : vector<4x32xf32>
    %71 = arith.divf %69, %70 : vector<4x32xf32>
    %72 = vector.extract_strided_slice %57 {offsets = [0, 32], sizes = [4, 32], strides = [1, 1]} : vector<4x96xf32> to vector<4x32xf32>
    %73 = vector.extract_strided_slice %63 {offsets = [0, 32], sizes = [4, 32], strides = [1, 1]} : vector<4x96xf32> to vector<4x32xf32>
    %74 = arith.addf %72, %73 : vector<4x32xf32>
    %75 = arith.negf %74 : vector<4x32xf32>
    %76 = math.exp %75 : vector<4x32xf32>
    %cst_26 = arith.constant 1.000000e+00 : f32
    %77 = vector.broadcast %cst_26 : f32 to vector<4x32xf32>
    %78 = arith.addf %77, %76 : vector<4x32xf32>
    %79 = arith.divf %77, %78 : vector<4x32xf32>
    %80 = vector.extract_strided_slice %57 {offsets = [0, 64], sizes = [4, 32], strides = [1, 1]} : vector<4x96xf32> to vector<4x32xf32>
    %81 = vector.extract_strided_slice %63 {offsets = [0, 64], sizes = [4, 32], strides = [1, 1]} : vector<4x96xf32> to vector<4x32xf32>
    %82 = arith.mulf %71, %81 : vector<4x32xf32>
    %83 = arith.addf %80, %82 : vector<4x32xf32>
    %84 = math.tanh %83 : vector<4x32xf32>
    %cst_27 = arith.constant 1.000000e+00 : f32
    %85 = vector.broadcast %cst_27 : f32 to vector<4x32xf32>
    %86 = arith.subf %85, %79 : vector<4x32xf32>
    %87 = arith.mulf %86, %84 : vector<4x32xf32>
    %88 = arith.mulf %79, %51 : vector<4x32xf32>
    %89 = arith.addf %87, %88 : vector<4x32xf32>
    %90 = vector.shape_cast %58 : vector<4x1xi1> to vector<4x1xi1>
    %91 = vector.broadcast %90 : vector<4x1xi1> to vector<4x32xi1>
    %92 = arith.select %91, %51, %89 : vector<4x32xi1>, vector<4x32xf32>
    %cst_28 = arith.constant 0.000000e+00 : f32
    %93 = vector.shape_cast %58 : vector<4x1xi1> to vector<4x1xi1>
    %94 = vector.broadcast %93 : vector<4x1xi1> to vector<4x32xi1>
    %95 = vector.broadcast %cst_28 : f32 to vector<4x32xf32>
    %96 = arith.select %94, %95, %92 : vector<4x32xi1>, vector<4x32xf32>
    %c4 = arith.constant 4 : index
    %c0_29 = arith.constant 0 : index
    %97 = vector.load %arg13[%c4, %c0_29] : memref<40x32xf32, #tpu.memory_space<vmem>>, vector<4x32xf32>
    tpu.vector_store %arg13[%c4, %c0_29], %96 {strides = array<i32>} : memref<40x32xf32, #tpu.memory_space<vmem>>, vector<4x32xf32>,
    %98 = vector.extract_strided_slice %14 {offsets = [8, 0], sizes = [4, 96], strides = [1, 1]} : vector<40x96xf32> to vector<4x96xf32>
    %99 = vector.extract_strided_slice %2 {offsets = [8, 0], sizes = [4, 1], strides = [1, 1]} : vector<40x1xi1> to vector<4x1xi1>
    %c0_30 = arith.constant 0 : index
    %c0_31 = arith.constant 0 : index
    %100 = vector.load %arg3[%c0_30, %c0_31] : memref<32x96xf32, #tpu.memory_space<vmem>>, vector<32x96xf32>
    %cst_32 = arith.constant dense<0.000000e+00> : vector<4x96xf32>
    %101 = tpu.matmul %92, %100, %cst_32 {dimension_numbers = #tpu.dot_dimension_numbers<[1], [0], [0], [1], [0, 0, 1, 1], [], []>} : vector<4x32xf32>, vector<32x96xf32>, vector<4x96xf32> -> vector<4x96xf32>
    %c0_33 = arith.constant 0 : index
    %c0_34 = arith.constant 0 : index
    %102 = vector.load %arg5[%c0_33, %c0_34] : memref<1x96xf32, #tpu.memory_space<vmem>>, vector<1x96xf32>
    %103 = vector.broadcast %102 : vector<1x96xf32> to vector<4x96xf32>
    %104 = arith.addf %101, %103 : vector<4x96xf32>
    %105 = vector.extract_strided_slice %98 {offsets = [0, 0], sizes = [4, 32], strides = [1, 1]} : vector<4x96xf32> to vector<4x32xf32>
    %106 = vector.extract_strided_slice %104 {offsets = [0, 0], sizes = [4, 32], strides = [1, 1]} : vector<4x96xf32> to vector<4x32xf32>
    %107 = arith.addf %105, %106 : vector<4x32xf32>
    %108 = arith.negf %107 : vector<4x32xf32>
    %109 = math.exp %108 : vector<4x32xf32>
    %cst_35 = arith.constant 1.000000e+00 : f32
    %110 = vector.broadcast %cst_35 : f32 to vector<4x32xf32>
    %111 = arith.addf %110, %109 : vector<4x32xf32>
    %112 = arith.divf %110, %111 : vector<4x32xf32>
    %113 = vector.extract_strided_slice %98 {offsets = [0, 32], sizes = [4, 32], strides = [1, 1]} : vector<4x96xf32> to vector<4x32xf32>
    %114 = vector.extract_strided_slice %104 {offsets = [0, 32], sizes = [4, 32], strides = [1, 1]} : vector<4x96xf32> to vector<4x32xf32>
    %115 = arith.addf %113, %114 : vector<4x32xf32>
    %116 = arith.negf %115 : vector<4x32xf32>
    %117 = math.exp %116 : vector<4x32xf32>
    %cst_36 = arith.constant 1.000000e+00 : f32
    %118 = vector.broadcast %cst_36 : f32 to vector<4x32xf32>
    %119 = arith.addf %118, %117 : vector<4x32xf32>
    %120 = arith.divf %118, %119 : vector<4x32xf32>
    %121 = vector.extract_strided_slice %98 {offsets = [0, 64], sizes = [4, 32], strides = [1, 1]} : vector<4x96xf32> to vector<4x32xf32>
    %122 = vector.extract_strided_slice %104 {offsets = [0, 64], sizes = [4, 32], strides = [1, 1]} : vector<4x96xf32> to vector<4x32xf32>
    %123 = arith.mulf %112, %122 : vector<4x32xf32>
    %124 = arith.addf %121, %123 : vector<4x32xf32>
    %125 = math.tanh %124 : vector<4x32xf32>
    %cst_37 = arith.constant 1.000000e+00 : f32
    %126 = vector.broadcast %cst_37 : f32 to vector<4x32xf32>
    %127 = arith.subf %126, %120 : vector<4x32xf32>
    %128 = arith.mulf %127, %125 : vector<4x32xf32>
    %129 = arith.mulf %120, %92 : vector<4x32xf32>
    %130 = arith.addf %128, %129 : vector<4x32xf32>
    %131 = vector.shape_cast %99 : vector<4x1xi1> to vector<4x1xi1>
    %132 = vector.broadcast %131 : vector<4x1xi1> to vector<4x32xi1>
    %133 = arith.select %132, %92, %130 : vector<4x32xi1>, vector<4x32xf32>
    %cst_38 = arith.constant 0.000000e+00 : f32
    %134 = vector.shape_cast %99 : vector<4x1xi1> to vector<4x1xi1>
    %135 = vector.broadcast %134 : vector<4x1xi1> to vector<4x32xi1>
    %136 = vector.broadcast %cst_38 : f32 to vector<4x32xf32>
    %137 = arith.select %135, %136, %133 : vector<4x32xi1>, vector<4x32xf32>
    %c8 = arith.constant 8 : index
    %c0_39 = arith.constant 0 : index
    %138 = vector.load %arg13[%c8, %c0_39] : memref<40x32xf32, #tpu.memory_space<vmem>>, vector<4x32xf32>
    tpu.vector_store %arg13[%c8, %c0_39], %137 {strides = array<i32>} : memref<40x32xf32, #tpu.memory_space<vmem>>, vector<4x32xf32>,
    %139 = vector.extract_strided_slice %14 {offsets = [12, 0], sizes = [4, 96], strides = [1, 1]} : vector<40x96xf32> to vector<4x96xf32>
    %140 = vector.extract_strided_slice %2 {offsets = [12, 0], sizes = [4, 1], strides = [1, 1]} : vector<40x1xi1> to vector<4x1xi1>
    %c0_40 = arith.constant 0 : index
    %c0_41 = arith.constant 0 : index
    %141 = vector.load %arg3[%c0_40, %c0_41] : memref<32x96xf32, #tpu.memory_space<vmem>>, vector<32x96xf32>
    %cst_42 = arith.constant dense<0.000000e+00> : vector<4x96xf32>
    %142 = tpu.matmul %133, %141, %cst_42 {dimension_numbers = #tpu.dot_dimension_numbers<[1], [0], [0], [1], [0, 0, 1, 1], [], []>} : vector<4x32xf32>, vector<32x96xf32>, vector<4x96xf32> -> vector<4x96xf32>
    %c0_43 = arith.constant 0 : index
    %c0_44 = arith.constant 0 : index
    %143 = vector.load %arg5[%c0_43, %c0_44] : memref<1x96xf32, #tpu.memory_space<vmem>>, vector<1x96xf32>
    %144 = vector.broadcast %143 : vector<1x96xf32> to vector<4x96xf32>
    %145 = arith.addf %142, %144 : vector<4x96xf32>
    %146 = vector.extract_strided_slice %139 {offsets = [0, 0], sizes = [4, 32], strides = [1, 1]} : vector<4x96xf32> to vector<4x32xf32>
    %147 = vector.extract_strided_slice %145 {offsets = [0, 0], sizes = [4, 32], strides = [1, 1]} : vector<4x96xf32> to vector<4x32xf32>
    %148 = arith.addf %146, %147 : vector<4x32xf32>
    %149 = arith.negf %148 : vector<4x32xf32>
    %150 = math.exp %149 : vector<4x32xf32>
    %cst_45 = arith.constant 1.000000e+00 : f32
    %151 = vector.broadcast %cst_45 : f32 to vector<4x32xf32>
    %152 = arith.addf %151, %150 : vector<4x32xf32>
    %153 = arith.divf %151, %152 : vector<4x32xf32>
    %154 = vector.extract_strided_slice %139 {offsets = [0, 32], sizes = [4, 32], strides = [1, 1]} : vector<4x96xf32> to vector<4x32xf32>
    %155 = vector.extract_strided_slice %145 {offsets = [0, 32], sizes = [4, 32], strides = [1, 1]} : vector<4x96xf32> to vector<4x32xf32>
    %156 = arith.addf %154, %155 : vector<4x32xf32>
    %157 = arith.negf %156 : vector<4x32xf32>
    %158 = math.exp %157 : vector<4x32xf32>
    %cst_46 = arith.constant 1.000000e+00 : f32
    %159 = vector.broadcast %cst_46 : f32 to vector<4x32xf32>
    %160 = arith.addf %159, %158 : vector<4x32xf32>
    %161 = arith.divf %159, %160 : vector<4x32xf32>
    %162 = vector.extract_strided_slice %139 {offsets = [0, 64], sizes = [4, 32], strides = [1, 1]} : vector<4x96xf32> to vector<4x32xf32>
    %163 = vector.extract_strided_slice %145 {offsets = [0, 64], sizes = [4, 32], strides = [1, 1]} : vector<4x96xf32> to vector<4x32xf32>
    %164 = arith.mulf %153, %163 : vector<4x32xf32>
    %165 = arith.addf %162, %164 : vector<4x32xf32>
    %166 = math.tanh %165 : vector<4x32xf32>
    %cst_47 = arith.constant 1.000000e+00 : f32
    %167 = vector.broadcast %cst_47 : f32 to vector<4x32xf32>
    %168 = arith.subf %167, %161 : vector<4x32xf32>
    %169 = arith.mulf %168, %166 : vector<4x32xf32>
    %170 = arith.mulf %161, %133 : vector<4x32xf32>
    %171 = arith.addf %169, %170 : vector<4x32xf32>
    %172 = vector.shape_cast %140 : vector<4x1xi1> to vector<4x1xi1>
    %173 = vector.broadcast %172 : vector<4x1xi1> to vector<4x32xi1>
    %174 = arith.select %173, %133, %171 : vector<4x32xi1>, vector<4x32xf32>
    %cst_48 = arith.constant 0.000000e+00 : f32
    %175 = vector.shape_cast %140 : vector<4x1xi1> to vector<4x1xi1>
    %176 = vector.broadcast %175 : vector<4x1xi1> to vector<4x32xi1>
    %177 = vector.broadcast %cst_48 : f32 to vector<4x32xf32>
    %178 = arith.select %176, %177, %174 : vector<4x32xi1>, vector<4x32xf32>
    %c12 = arith.constant 12 : index
    %c0_49 = arith.constant 0 : index
    %179 = vector.load %arg13[%c12, %c0_49] : memref<40x32xf32, #tpu.memory_space<vmem>>, vector<4x32xf32>
    tpu.vector_store %arg13[%c12, %c0_49], %178 {strides = array<i32>} : memref<40x32xf32, #tpu.memory_space<vmem>>, vector<4x32xf32>,
    %180 = vector.extract_strided_slice %14 {offsets = [16, 0], sizes = [4, 96], strides = [1, 1]} : vector<40x96xf32> to vector<4x96xf32>
    %181 = vector.extract_strided_slice %2 {offsets = [16, 0], sizes = [4, 1], strides = [1, 1]} : vector<40x1xi1> to vector<4x1xi1>
    %c0_50 = arith.constant 0 : index
    %c0_51 = arith.constant 0 : index
    %182 = vector.load %arg3[%c0_50, %c0_51] : memref<32x96xf32, #tpu.memory_space<vmem>>, vector<32x96xf32>
    %cst_52 = arith.constant dense<0.000000e+00> : vector<4x96xf32>
    %183 = tpu.matmul %174, %182, %cst_52 {dimension_numbers = #tpu.dot_dimension_numbers<[1], [0], [0], [1], [0, 0, 1, 1], [], []>} : vector<4x32xf32>, vector<32x96xf32>, vector<4x96xf32> -> vector<4x96xf32>
    %c0_53 = arith.constant 0 : index
    %c0_54 = arith.constant 0 : index
    %184 = vector.load %arg5[%c0_53, %c0_54] : memref<1x96xf32, #tpu.memory_space<vmem>>, vector<1x96xf32>
    %185 = vector.broadcast %184 : vector<1x96xf32> to vector<4x96xf32>
    %186 = arith.addf %183, %185 : vector<4x96xf32>
    %187 = vector.extract_strided_slice %180 {offsets = [0, 0], sizes = [4, 32], strides = [1, 1]} : vector<4x96xf32> to vector<4x32xf32>
    %188 = vector.extract_strided_slice %186 {offsets = [0, 0], sizes = [4, 32], strides = [1, 1]} : vector<4x96xf32> to vector<4x32xf32>
    %189 = arith.addf %187, %188 : vector<4x32xf32>
    %190 = arith.negf %189 : vector<4x32xf32>
    %191 = math.exp %190 : vector<4x32xf32>
    %cst_55 = arith.constant 1.000000e+00 : f32
    %192 = vector.broadcast %cst_55 : f32 to vector<4x32xf32>
    %193 = arith.addf %192, %191 : vector<4x32xf32>
    %194 = arith.divf %192, %193 : vector<4x32xf32>
    %195 = vector.extract_strided_slice %180 {offsets = [0, 32], sizes = [4, 32], strides = [1, 1]} : vector<4x96xf32> to vector<4x32xf32>
    %196 = vector.extract_strided_slice %186 {offsets = [0, 32], sizes = [4, 32], strides = [1, 1]} : vector<4x96xf32> to vector<4x32xf32>
    %197 = arith.addf %195, %196 : vector<4x32xf32>
    %198 = arith.negf %197 : vector<4x32xf32>
    %199 = math.exp %198 : vector<4x32xf32>
    %cst_56 = arith.constant 1.000000e+00 : f32
    %200 = vector.broadcast %cst_56 : f32 to vector<4x32xf32>
    %201 = arith.addf %200, %199 : vector<4x32xf32>
    %202 = arith.divf %200, %201 : vector<4x32xf32>
    %203 = vector.extract_strided_slice %180 {offsets = [0, 64], sizes = [4, 32], strides = [1, 1]} : vector<4x96xf32> to vector<4x32xf32>
    %204 = vector.extract_strided_slice %186 {offsets = [0, 64], sizes = [4, 32], strides = [1, 1]} : vector<4x96xf32> to vector<4x32xf32>
    %205 = arith.mulf %194, %204 : vector<4x32xf32>
    %206 = arith.addf %203, %205 : vector<4x32xf32>
    %207 = math.tanh %206 : vector<4x32xf32>
    %cst_57 = arith.constant 1.000000e+00 : f32
    %208 = vector.broadcast %cst_57 : f32 to vector<4x32xf32>
    %209 = arith.subf %208, %202 : vector<4x32xf32>
    %210 = arith.mulf %209, %207 : vector<4x32xf32>
    %211 = arith.mulf %202, %174 : vector<4x32xf32>
    %212 = arith.addf %210, %211 : vector<4x32xf32>
    %213 = vector.shape_cast %181 : vector<4x1xi1> to vector<4x1xi1>
    %214 = vector.broadcast %213 : vector<4x1xi1> to vector<4x32xi1>
    %215 = arith.select %214, %174, %212 : vector<4x32xi1>, vector<4x32xf32>
    %cst_58 = arith.constant 0.000000e+00 : f32
    %216 = vector.shape_cast %181 : vector<4x1xi1> to vector<4x1xi1>
    %217 = vector.broadcast %216 : vector<4x1xi1> to vector<4x32xi1>
    %218 = vector.broadcast %cst_58 : f32 to vector<4x32xf32>
    %219 = arith.select %217, %218, %215 : vector<4x32xi1>, vector<4x32xf32>
    %c16 = arith.constant 16 : index
    %c0_59 = arith.constant 0 : index
    %220 = vector.load %arg13[%c16, %c0_59] : memref<40x32xf32, #tpu.memory_space<vmem>>, vector<4x32xf32>
    tpu.vector_store %arg13[%c16, %c0_59], %219 {strides = array<i32>} : memref<40x32xf32, #tpu.memory_space<vmem>>, vector<4x32xf32>,
    %221 = vector.extract_strided_slice %14 {offsets = [20, 0], sizes = [4, 96], strides = [1, 1]} : vector<40x96xf32> to vector<4x96xf32>
    %222 = vector.extract_strided_slice %2 {offsets = [20, 0], sizes = [4, 1], strides = [1, 1]} : vector<40x1xi1> to vector<4x1xi1>
    %c0_60 = arith.constant 0 : index
    %c0_61 = arith.constant 0 : index
    %223 = vector.load %arg3[%c0_60, %c0_61] : memref<32x96xf32, #tpu.memory_space<vmem>>, vector<32x96xf32>
    %cst_62 = arith.constant dense<0.000000e+00> : vector<4x96xf32>
    %224 = tpu.matmul %215, %223, %cst_62 {dimension_numbers = #tpu.dot_dimension_numbers<[1], [0], [0], [1], [0, 0, 1, 1], [], []>} : vector<4x32xf32>, vector<32x96xf32>, vector<4x96xf32> -> vector<4x96xf32>
    %c0_63 = arith.constant 0 : index
    %c0_64 = arith.constant 0 : index
    %225 = vector.load %arg5[%c0_63, %c0_64] : memref<1x96xf32, #tpu.memory_space<vmem>>, vector<1x96xf32>
    %226 = vector.broadcast %225 : vector<1x96xf32> to vector<4x96xf32>
    %227 = arith.addf %224, %226 : vector<4x96xf32>
    %228 = vector.extract_strided_slice %221 {offsets = [0, 0], sizes = [4, 32], strides = [1, 1]} : vector<4x96xf32> to vector<4x32xf32>
    %229 = vector.extract_strided_slice %227 {offsets = [0, 0], sizes = [4, 32], strides = [1, 1]} : vector<4x96xf32> to vector<4x32xf32>
    %230 = arith.addf %228, %229 : vector<4x32xf32>
    %231 = arith.negf %230 : vector<4x32xf32>
    %232 = math.exp %231 : vector<4x32xf32>
    %cst_65 = arith.constant 1.000000e+00 : f32
    %233 = vector.broadcast %cst_65 : f32 to vector<4x32xf32>
    %234 = arith.addf %233, %232 : vector<4x32xf32>
    %235 = arith.divf %233, %234 : vector<4x32xf32>
    %236 = vector.extract_strided_slice %221 {offsets = [0, 32], sizes = [4, 32], strides = [1, 1]} : vector<4x96xf32> to vector<4x32xf32>
    %237 = vector.extract_strided_slice %227 {offsets = [0, 32], sizes = [4, 32], strides = [1, 1]} : vector<4x96xf32> to vector<4x32xf32>
    %238 = arith.addf %236, %237 : vector<4x32xf32>
    %239 = arith.negf %238 : vector<4x32xf32>
    %240 = math.exp %239 : vector<4x32xf32>
    %cst_66 = arith.constant 1.000000e+00 : f32
    %241 = vector.broadcast %cst_66 : f32 to vector<4x32xf32>
    %242 = arith.addf %241, %240 : vector<4x32xf32>
    %243 = arith.divf %241, %242 : vector<4x32xf32>
    %244 = vector.extract_strided_slice %221 {offsets = [0, 64], sizes = [4, 32], strides = [1, 1]} : vector<4x96xf32> to vector<4x32xf32>
    %245 = vector.extract_strided_slice %227 {offsets = [0, 64], sizes = [4, 32], strides = [1, 1]} : vector<4x96xf32> to vector<4x32xf32>
    %246 = arith.mulf %235, %245 : vector<4x32xf32>
    %247 = arith.addf %244, %246 : vector<4x32xf32>
    %248 = math.tanh %247 : vector<4x32xf32>
    %cst_67 = arith.constant 1.000000e+00 : f32
    %249 = vector.broadcast %cst_67 : f32 to vector<4x32xf32>
    %250 = arith.subf %249, %243 : vector<4x32xf32>
    %251 = arith.mulf %250, %248 : vector<4x32xf32>
    %252 = arith.mulf %243, %215 : vector<4x32xf32>
    %253 = arith.addf %251, %252 : vector<4x32xf32>
    %254 = vector.shape_cast %222 : vector<4x1xi1> to vector<4x1xi1>
    %255 = vector.broadcast %254 : vector<4x1xi1> to vector<4x32xi1>
    %256 = arith.select %255, %215, %253 : vector<4x32xi1>, vector<4x32xf32>
    %cst_68 = arith.constant 0.000000e+00 : f32
    %257 = vector.shape_cast %222 : vector<4x1xi1> to vector<4x1xi1>
    %258 = vector.broadcast %257 : vector<4x1xi1> to vector<4x32xi1>
    %259 = vector.broadcast %cst_68 : f32 to vector<4x32xf32>
    %260 = arith.select %258, %259, %256 : vector<4x32xi1>, vector<4x32xf32>
    %c20 = arith.constant 20 : index
    %c0_69 = arith.constant 0 : index
    %261 = vector.load %arg13[%c20, %c0_69] : memref<40x32xf32, #tpu.memory_space<vmem>>, vector<4x32xf32>
    tpu.vector_store %arg13[%c20, %c0_69], %260 {strides = array<i32>} : memref<40x32xf32, #tpu.memory_space<vmem>>, vector<4x32xf32>,
    %262 = vector.extract_strided_slice %14 {offsets = [24, 0], sizes = [4, 96], strides = [1, 1]} : vector<40x96xf32> to vector<4x96xf32>
    %263 = vector.extract_strided_slice %2 {offsets = [24, 0], sizes = [4, 1], strides = [1, 1]} : vector<40x1xi1> to vector<4x1xi1>
    %c0_70 = arith.constant 0 : index
    %c0_71 = arith.constant 0 : index
    %264 = vector.load %arg3[%c0_70, %c0_71] : memref<32x96xf32, #tpu.memory_space<vmem>>, vector<32x96xf32>
    %cst_72 = arith.constant dense<0.000000e+00> : vector<4x96xf32>
    %265 = tpu.matmul %256, %264, %cst_72 {dimension_numbers = #tpu.dot_dimension_numbers<[1], [0], [0], [1], [0, 0, 1, 1], [], []>} : vector<4x32xf32>, vector<32x96xf32>, vector<4x96xf32> -> vector<4x96xf32>
    %c0_73 = arith.constant 0 : index
    %c0_74 = arith.constant 0 : index
    %266 = vector.load %arg5[%c0_73, %c0_74] : memref<1x96xf32, #tpu.memory_space<vmem>>, vector<1x96xf32>
    %267 = vector.broadcast %266 : vector<1x96xf32> to vector<4x96xf32>
    %268 = arith.addf %265, %267 : vector<4x96xf32>
    %269 = vector.extract_strided_slice %262 {offsets = [0, 0], sizes = [4, 32], strides = [1, 1]} : vector<4x96xf32> to vector<4x32xf32>
    %270 = vector.extract_strided_slice %268 {offsets = [0, 0], sizes = [4, 32], strides = [1, 1]} : vector<4x96xf32> to vector<4x32xf32>
    %271 = arith.addf %269, %270 : vector<4x32xf32>
    %272 = arith.negf %271 : vector<4x32xf32>
    %273 = math.exp %272 : vector<4x32xf32>
    %cst_75 = arith.constant 1.000000e+00 : f32
    %274 = vector.broadcast %cst_75 : f32 to vector<4x32xf32>
    %275 = arith.addf %274, %273 : vector<4x32xf32>
    %276 = arith.divf %274, %275 : vector<4x32xf32>
    %277 = vector.extract_strided_slice %262 {offsets = [0, 32], sizes = [4, 32], strides = [1, 1]} : vector<4x96xf32> to vector<4x32xf32>
    %278 = vector.extract_strided_slice %268 {offsets = [0, 32], sizes = [4, 32], strides = [1, 1]} : vector<4x96xf32> to vector<4x32xf32>
    %279 = arith.addf %277, %278 : vector<4x32xf32>
    %280 = arith.negf %279 : vector<4x32xf32>
    %281 = math.exp %280 : vector<4x32xf32>
    %cst_76 = arith.constant 1.000000e+00 : f32
    %282 = vector.broadcast %cst_76 : f32 to vector<4x32xf32>
    %283 = arith.addf %282, %281 : vector<4x32xf32>
    %284 = arith.divf %282, %283 : vector<4x32xf32>
    %285 = vector.extract_strided_slice %262 {offsets = [0, 64], sizes = [4, 32], strides = [1, 1]} : vector<4x96xf32> to vector<4x32xf32>
    %286 = vector.extract_strided_slice %268 {offsets = [0, 64], sizes = [4, 32], strides = [1, 1]} : vector<4x96xf32> to vector<4x32xf32>
    %287 = arith.mulf %276, %286 : vector<4x32xf32>
    %288 = arith.addf %285, %287 : vector<4x32xf32>
    %289 = math.tanh %288 : vector<4x32xf32>
    %cst_77 = arith.constant 1.000000e+00 : f32
    %290 = vector.broadcast %cst_77 : f32 to vector<4x32xf32>
    %291 = arith.subf %290, %284 : vector<4x32xf32>
    %292 = arith.mulf %291, %289 : vector<4x32xf32>
    %293 = arith.mulf %284, %256 : vector<4x32xf32>
    %294 = arith.addf %292, %293 : vector<4x32xf32>
    %295 = vector.shape_cast %263 : vector<4x1xi1> to vector<4x1xi1>
    %296 = vector.broadcast %295 : vector<4x1xi1> to vector<4x32xi1>
    %297 = arith.select %296, %256, %294 : vector<4x32xi1>, vector<4x32xf32>
    %cst_78 = arith.constant 0.000000e+00 : f32
    %298 = vector.shape_cast %263 : vector<4x1xi1> to vector<4x1xi1>
    %299 = vector.broadcast %298 : vector<4x1xi1> to vector<4x32xi1>
    %300 = vector.broadcast %cst_78 : f32 to vector<4x32xf32>
    %301 = arith.select %299, %300, %297 : vector<4x32xi1>, vector<4x32xf32>
    %c24 = arith.constant 24 : index
    %c0_79 = arith.constant 0 : index
    %302 = vector.load %arg13[%c24, %c0_79] : memref<40x32xf32, #tpu.memory_space<vmem>>, vector<4x32xf32>
    tpu.vector_store %arg13[%c24, %c0_79], %301 {strides = array<i32>} : memref<40x32xf32, #tpu.memory_space<vmem>>, vector<4x32xf32>,
    %303 = vector.extract_strided_slice %14 {offsets = [28, 0], sizes = [4, 96], strides = [1, 1]} : vector<40x96xf32> to vector<4x96xf32>
    %304 = vector.extract_strided_slice %2 {offsets = [28, 0], sizes = [4, 1], strides = [1, 1]} : vector<40x1xi1> to vector<4x1xi1>
    %c0_80 = arith.constant 0 : index
    %c0_81 = arith.constant 0 : index
    %305 = vector.load %arg3[%c0_80, %c0_81] : memref<32x96xf32, #tpu.memory_space<vmem>>, vector<32x96xf32>
    %cst_82 = arith.constant dense<0.000000e+00> : vector<4x96xf32>
    %306 = tpu.matmul %297, %305, %cst_82 {dimension_numbers = #tpu.dot_dimension_numbers<[1], [0], [0], [1], [0, 0, 1, 1], [], []>} : vector<4x32xf32>, vector<32x96xf32>, vector<4x96xf32> -> vector<4x96xf32>
    %c0_83 = arith.constant 0 : index
    %c0_84 = arith.constant 0 : index
    %307 = vector.load %arg5[%c0_83, %c0_84] : memref<1x96xf32, #tpu.memory_space<vmem>>, vector<1x96xf32>
    %308 = vector.broadcast %307 : vector<1x96xf32> to vector<4x96xf32>
    %309 = arith.addf %306, %308 : vector<4x96xf32>
    %310 = vector.extract_strided_slice %303 {offsets = [0, 0], sizes = [4, 32], strides = [1, 1]} : vector<4x96xf32> to vector<4x32xf32>
    %311 = vector.extract_strided_slice %309 {offsets = [0, 0], sizes = [4, 32], strides = [1, 1]} : vector<4x96xf32> to vector<4x32xf32>
    %312 = arith.addf %310, %311 : vector<4x32xf32>
    %313 = arith.negf %312 : vector<4x32xf32>
    %314 = math.exp %313 : vector<4x32xf32>
    %cst_85 = arith.constant 1.000000e+00 : f32
    %315 = vector.broadcast %cst_85 : f32 to vector<4x32xf32>
    %316 = arith.addf %315, %314 : vector<4x32xf32>
    %317 = arith.divf %315, %316 : vector<4x32xf32>
    %318 = vector.extract_strided_slice %303 {offsets = [0, 32], sizes = [4, 32], strides = [1, 1]} : vector<4x96xf32> to vector<4x32xf32>
    %319 = vector.extract_strided_slice %309 {offsets = [0, 32], sizes = [4, 32], strides = [1, 1]} : vector<4x96xf32> to vector<4x32xf32>
    %320 = arith.addf %318, %319 : vector<4x32xf32>
    %321 = arith.negf %320 : vector<4x32xf32>
    %322 = math.exp %321 : vector<4x32xf32>
    %cst_86 = arith.constant 1.000000e+00 : f32
    %323 = vector.broadcast %cst_86 : f32 to vector<4x32xf32>
    %324 = arith.addf %323, %322 : vector<4x32xf32>
    %325 = arith.divf %323, %324 : vector<4x32xf32>
    %326 = vector.extract_strided_slice %303 {offsets = [0, 64], sizes = [4, 32], strides = [1, 1]} : vector<4x96xf32> to vector<4x32xf32>
    %327 = vector.extract_strided_slice %309 {offsets = [0, 64], sizes = [4, 32], strides = [1, 1]} : vector<4x96xf32> to vector<4x32xf32>
    %328 = arith.mulf %317, %327 : vector<4x32xf32>
    %329 = arith.addf %326, %328 : vector<4x32xf32>
    %330 = math.tanh %329 : vector<4x32xf32>
    %cst_87 = arith.constant 1.000000e+00 : f32
    %331 = vector.broadcast %cst_87 : f32 to vector<4x32xf32>
    %332 = arith.subf %331, %325 : vector<4x32xf32>
    %333 = arith.mulf %332, %330 : vector<4x32xf32>
    %334 = arith.mulf %325, %297 : vector<4x32xf32>
    %335 = arith.addf %333, %334 : vector<4x32xf32>
    %336 = vector.shape_cast %304 : vector<4x1xi1> to vector<4x1xi1>
    %337 = vector.broadcast %336 : vector<4x1xi1> to vector<4x32xi1>
    %338 = arith.select %337, %297, %335 : vector<4x32xi1>, vector<4x32xf32>
    %cst_88 = arith.constant 0.000000e+00 : f32
    %339 = vector.shape_cast %304 : vector<4x1xi1> to vector<4x1xi1>
    %340 = vector.broadcast %339 : vector<4x1xi1> to vector<4x32xi1>
    %341 = vector.broadcast %cst_88 : f32 to vector<4x32xf32>
    %342 = arith.select %340, %341, %338 : vector<4x32xi1>, vector<4x32xf32>
    %c28 = arith.constant 28 : index
    %c0_89 = arith.constant 0 : index
    %343 = vector.load %arg13[%c28, %c0_89] : memref<40x32xf32, #tpu.memory_space<vmem>>, vector<4x32xf32>
    tpu.vector_store %arg13[%c28, %c0_89], %342 {strides = array<i32>} : memref<40x32xf32, #tpu.memory_space<vmem>>, vector<4x32xf32>,
    %344 = vector.extract_strided_slice %14 {offsets = [32, 0], sizes = [4, 96], strides = [1, 1]} : vector<40x96xf32> to vector<4x96xf32>
    %345 = vector.extract_strided_slice %2 {offsets = [32, 0], sizes = [4, 1], strides = [1, 1]} : vector<40x1xi1> to vector<4x1xi1>
    %c0_90 = arith.constant 0 : index
    %c0_91 = arith.constant 0 : index
    %346 = vector.load %arg3[%c0_90, %c0_91] : memref<32x96xf32, #tpu.memory_space<vmem>>, vector<32x96xf32>
    %cst_92 = arith.constant dense<0.000000e+00> : vector<4x96xf32>
    %347 = tpu.matmul %338, %346, %cst_92 {dimension_numbers = #tpu.dot_dimension_numbers<[1], [0], [0], [1], [0, 0, 1, 1], [], []>} : vector<4x32xf32>, vector<32x96xf32>, vector<4x96xf32> -> vector<4x96xf32>
    %c0_93 = arith.constant 0 : index
    %c0_94 = arith.constant 0 : index
    %348 = vector.load %arg5[%c0_93, %c0_94] : memref<1x96xf32, #tpu.memory_space<vmem>>, vector<1x96xf32>
    %349 = vector.broadcast %348 : vector<1x96xf32> to vector<4x96xf32>
    %350 = arith.addf %347, %349 : vector<4x96xf32>
    %351 = vector.extract_strided_slice %344 {offsets = [0, 0], sizes = [4, 32], strides = [1, 1]} : vector<4x96xf32> to vector<4x32xf32>
    %352 = vector.extract_strided_slice %350 {offsets = [0, 0], sizes = [4, 32], strides = [1, 1]} : vector<4x96xf32> to vector<4x32xf32>
    %353 = arith.addf %351, %352 : vector<4x32xf32>
    %354 = arith.negf %353 : vector<4x32xf32>
    %355 = math.exp %354 : vector<4x32xf32>
    %cst_95 = arith.constant 1.000000e+00 : f32
    %356 = vector.broadcast %cst_95 : f32 to vector<4x32xf32>
    %357 = arith.addf %356, %355 : vector<4x32xf32>
    %358 = arith.divf %356, %357 : vector<4x32xf32>
    %359 = vector.extract_strided_slice %344 {offsets = [0, 32], sizes = [4, 32], strides = [1, 1]} : vector<4x96xf32> to vector<4x32xf32>
    %360 = vector.extract_strided_slice %350 {offsets = [0, 32], sizes = [4, 32], strides = [1, 1]} : vector<4x96xf32> to vector<4x32xf32>
    %361 = arith.addf %359, %360 : vector<4x32xf32>
    %362 = arith.negf %361 : vector<4x32xf32>
    %363 = math.exp %362 : vector<4x32xf32>
    %cst_96 = arith.constant 1.000000e+00 : f32
    %364 = vector.broadcast %cst_96 : f32 to vector<4x32xf32>
    %365 = arith.addf %364, %363 : vector<4x32xf32>
    %366 = arith.divf %364, %365 : vector<4x32xf32>
    %367 = vector.extract_strided_slice %344 {offsets = [0, 64], sizes = [4, 32], strides = [1, 1]} : vector<4x96xf32> to vector<4x32xf32>
    %368 = vector.extract_strided_slice %350 {offsets = [0, 64], sizes = [4, 32], strides = [1, 1]} : vector<4x96xf32> to vector<4x32xf32>
    %369 = arith.mulf %358, %368 : vector<4x32xf32>
    %370 = arith.addf %367, %369 : vector<4x32xf32>
    %371 = math.tanh %370 : vector<4x32xf32>
    %cst_97 = arith.constant 1.000000e+00 : f32
    %372 = vector.broadcast %cst_97 : f32 to vector<4x32xf32>
    %373 = arith.subf %372, %366 : vector<4x32xf32>
    %374 = arith.mulf %373, %371 : vector<4x32xf32>
    %375 = arith.mulf %366, %338 : vector<4x32xf32>
    %376 = arith.addf %374, %375 : vector<4x32xf32>
    %377 = vector.shape_cast %345 : vector<4x1xi1> to vector<4x1xi1>
    %378 = vector.broadcast %377 : vector<4x1xi1> to vector<4x32xi1>
    %379 = arith.select %378, %338, %376 : vector<4x32xi1>, vector<4x32xf32>
    %cst_98 = arith.constant 0.000000e+00 : f32
    %380 = vector.shape_cast %345 : vector<4x1xi1> to vector<4x1xi1>
    %381 = vector.broadcast %380 : vector<4x1xi1> to vector<4x32xi1>
    %382 = vector.broadcast %cst_98 : f32 to vector<4x32xf32>
    %383 = arith.select %381, %382, %379 : vector<4x32xi1>, vector<4x32xf32>
    %c32 = arith.constant 32 : index
    %c0_99 = arith.constant 0 : index
    %384 = vector.load %arg13[%c32, %c0_99] : memref<40x32xf32, #tpu.memory_space<vmem>>, vector<4x32xf32>
    tpu.vector_store %arg13[%c32, %c0_99], %383 {strides = array<i32>} : memref<40x32xf32, #tpu.memory_space<vmem>>, vector<4x32xf32>,
    %385 = vector.extract_strided_slice %14 {offsets = [36, 0], sizes = [4, 96], strides = [1, 1]} : vector<40x96xf32> to vector<4x96xf32>
    %386 = vector.extract_strided_slice %2 {offsets = [36, 0], sizes = [4, 1], strides = [1, 1]} : vector<40x1xi1> to vector<4x1xi1>
    %c0_100 = arith.constant 0 : index
    %c0_101 = arith.constant 0 : index
    %387 = vector.load %arg3[%c0_100, %c0_101] : memref<32x96xf32, #tpu.memory_space<vmem>>, vector<32x96xf32>
    %cst_102 = arith.constant dense<0.000000e+00> : vector<4x96xf32>
    %388 = tpu.matmul %379, %387, %cst_102 {dimension_numbers = #tpu.dot_dimension_numbers<[1], [0], [0], [1], [0, 0, 1, 1], [], []>} : vector<4x32xf32>, vector<32x96xf32>, vector<4x96xf32> -> vector<4x96xf32>
    %c0_103 = arith.constant 0 : index
    %c0_104 = arith.constant 0 : index
    %389 = vector.load %arg5[%c0_103, %c0_104] : memref<1x96xf32, #tpu.memory_space<vmem>>, vector<1x96xf32>
    %390 = vector.broadcast %389 : vector<1x96xf32> to vector<4x96xf32>
    %391 = arith.addf %388, %390 : vector<4x96xf32>
    %392 = vector.extract_strided_slice %385 {offsets = [0, 0], sizes = [4, 32], strides = [1, 1]} : vector<4x96xf32> to vector<4x32xf32>
    %393 = vector.extract_strided_slice %391 {offsets = [0, 0], sizes = [4, 32], strides = [1, 1]} : vector<4x96xf32> to vector<4x32xf32>
    %394 = arith.addf %392, %393 : vector<4x32xf32>
    %395 = arith.negf %394 : vector<4x32xf32>
    %396 = math.exp %395 : vector<4x32xf32>
    %cst_105 = arith.constant 1.000000e+00 : f32
    %397 = vector.broadcast %cst_105 : f32 to vector<4x32xf32>
    %398 = arith.addf %397, %396 : vector<4x32xf32>
    %399 = arith.divf %397, %398 : vector<4x32xf32>
    %400 = vector.extract_strided_slice %385 {offsets = [0, 32], sizes = [4, 32], strides = [1, 1]} : vector<4x96xf32> to vector<4x32xf32>
    %401 = vector.extract_strided_slice %391 {offsets = [0, 32], sizes = [4, 32], strides = [1, 1]} : vector<4x96xf32> to vector<4x32xf32>
    %402 = arith.addf %400, %401 : vector<4x32xf32>
    %403 = arith.negf %402 : vector<4x32xf32>
    %404 = math.exp %403 : vector<4x32xf32>
    %cst_106 = arith.constant 1.000000e+00 : f32
    %405 = vector.broadcast %cst_106 : f32 to vector<4x32xf32>
    %406 = arith.addf %405, %404 : vector<4x32xf32>
    %407 = arith.divf %405, %406 : vector<4x32xf32>
    %408 = vector.extract_strided_slice %385 {offsets = [0, 64], sizes = [4, 32], strides = [1, 1]} : vector<4x96xf32> to vector<4x32xf32>
    %409 = vector.extract_strided_slice %391 {offsets = [0, 64], sizes = [4, 32], strides = [1, 1]} : vector<4x96xf32> to vector<4x32xf32>
    %410 = arith.mulf %399, %409 : vector<4x32xf32>
    %411 = arith.addf %408, %410 : vector<4x32xf32>
    %412 = math.tanh %411 : vector<4x32xf32>
    %cst_107 = arith.constant 1.000000e+00 : f32
    %413 = vector.broadcast %cst_107 : f32 to vector<4x32xf32>
    %414 = arith.subf %413, %407 : vector<4x32xf32>
    %415 = arith.mulf %414, %412 : vector<4x32xf32>
    %416 = arith.mulf %407, %379 : vector<4x32xf32>
    %417 = arith.addf %415, %416 : vector<4x32xf32>
    %418 = vector.shape_cast %386 : vector<4x1xi1> to vector<4x1xi1>
    %419 = vector.broadcast %418 : vector<4x1xi1> to vector<4x32xi1>
    %420 = arith.select %419, %379, %417 : vector<4x32xi1>, vector<4x32xf32>
    %cst_108 = arith.constant 0.000000e+00 : f32
    %421 = vector.shape_cast %386 : vector<4x1xi1> to vector<4x1xi1>
    %422 = vector.broadcast %421 : vector<4x1xi1> to vector<4x32xi1>
    %423 = vector.broadcast %cst_108 : f32 to vector<4x32xf32>
    %424 = arith.select %422, %423, %420 : vector<4x32xi1>, vector<4x32xf32>
    %c36 = arith.constant 36 : index
    %c0_109 = arith.constant 0 : index
    %425 = vector.load %arg13[%c36, %c0_109] : memref<40x32xf32, #tpu.memory_space<vmem>>, vector<4x32xf32>
    tpu.vector_store %arg13[%c36, %c0_109], %424 {strides = array<i32>} : memref<40x32xf32, #tpu.memory_space<vmem>>, vector<4x32xf32>,
    %c0_110 = arith.constant 0 : index
    %c0_111 = arith.constant 0 : index
    %426 = vector.load %arg13[%c0_110, %c0_111] : memref<40x32xf32, #tpu.memory_space<vmem>>, vector<40x32xf32>
    %c0_112 = arith.constant 0 : index
    %c0_113 = arith.constant 0 : index
    %427 = vector.load %arg6[%c0_112, %c0_113] : memref<32x32xf32, #tpu.memory_space<vmem>>, vector<32x32xf32>
    %cst_114 = arith.constant dense<0.000000e+00> : vector<40x32xf32>
    %428 = tpu.matmul %426, %427, %cst_114 {dimension_numbers = #tpu.dot_dimension_numbers<[1], [0], [0], [1], [0, 0, 1, 1], [], []>} : vector<40x32xf32>, vector<32x32xf32>, vector<40x32xf32> -> vector<40x32xf32>
    %c0_115 = arith.constant 0 : index
    %c0_116 = arith.constant 0 : index
    %429 = vector.load %arg7[%c0_115, %c0_116] : memref<1x32xf32, #tpu.memory_space<vmem>>, vector<1x32xf32>
    %430 = vector.broadcast %429 : vector<1x32xf32> to vector<40x32xf32>
    %431 = arith.addf %428, %430 : vector<40x32xf32>
    %432 = math.tanh %431 : vector<40x32xf32>
    %c0_117 = arith.constant 0 : index
    %c0_118 = arith.constant 0 : index
    %433 = vector.load %arg8[%c0_117, %c0_118] : memref<32x1xf32, #tpu.memory_space<vmem>>, vector<32x1xf32>
    %cst_119 = arith.constant dense<0.000000e+00> : vector<40x1xf32>
    %434 = tpu.matmul %432, %433, %cst_119 {dimension_numbers = #tpu.dot_dimension_numbers<[1], [0], [0], [1], [0, 0, 1, 1], [], []>} : vector<40x32xf32>, vector<32x1xf32>, vector<40x1xf32> -> vector<40x1xf32>
    %c0_120 = arith.constant 0 : index
    %c0_121 = arith.constant 0 : index
    %435 = vector.load %arg9[%c0_120, %c0_121] : memref<1x1xf32, #tpu.memory_space<vmem>>, vector<1x1xf32>
    %436 = vector.broadcast %435 : vector<1x1xf32> to vector<40x1xf32>
    %437 = arith.addf %434, %436 : vector<40x1xf32>
    %cst_122 = arith.constant -1.000000e+30 : f32
    %438 = vector.broadcast %cst_122 : f32 to vector<40x1xf32>
    %439 = arith.select %2, %438, %437 : vector<40x1xi1>, vector<40x1xf32>
    %440 = vector.extract_strided_slice %439 {offsets = [0, 0], sizes = [4, 1], strides = [1, 1]} : vector<40x1xf32> to vector<4x1xf32>
    %441 = vector.extract_strided_slice %439 {offsets = [4, 0], sizes = [4, 1], strides = [1, 1]} : vector<40x1xf32> to vector<4x1xf32>
    %442 = arith.maximumf %440, %441 : vector<4x1xf32>
    %443 = vector.extract_strided_slice %439 {offsets = [8, 0], sizes = [4, 1], strides = [1, 1]} : vector<40x1xf32> to vector<4x1xf32>
    %444 = arith.maximumf %442, %443 : vector<4x1xf32>
    %445 = vector.extract_strided_slice %439 {offsets = [12, 0], sizes = [4, 1], strides = [1, 1]} : vector<40x1xf32> to vector<4x1xf32>
    %446 = arith.maximumf %444, %445 : vector<4x1xf32>
    %447 = vector.extract_strided_slice %439 {offsets = [16, 0], sizes = [4, 1], strides = [1, 1]} : vector<40x1xf32> to vector<4x1xf32>
    %448 = arith.maximumf %446, %447 : vector<4x1xf32>
    %449 = vector.extract_strided_slice %439 {offsets = [20, 0], sizes = [4, 1], strides = [1, 1]} : vector<40x1xf32> to vector<4x1xf32>
    %450 = arith.maximumf %448, %449 : vector<4x1xf32>
    %451 = vector.extract_strided_slice %439 {offsets = [24, 0], sizes = [4, 1], strides = [1, 1]} : vector<40x1xf32> to vector<4x1xf32>
    %452 = arith.maximumf %450, %451 : vector<4x1xf32>
    %453 = vector.extract_strided_slice %439 {offsets = [28, 0], sizes = [4, 1], strides = [1, 1]} : vector<40x1xf32> to vector<4x1xf32>
    %454 = arith.maximumf %452, %453 : vector<4x1xf32>
    %455 = vector.extract_strided_slice %439 {offsets = [32, 0], sizes = [4, 1], strides = [1, 1]} : vector<40x1xf32> to vector<4x1xf32>
    %456 = arith.maximumf %454, %455 : vector<4x1xf32>
    %457 = vector.extract_strided_slice %439 {offsets = [36, 0], sizes = [4, 1], strides = [1, 1]} : vector<40x1xf32> to vector<4x1xf32>
    %458 = arith.maximumf %456, %457 : vector<4x1xf32>
    %cst_123 = arith.constant 0.000000e+00 : f32
    %459 = vector.broadcast %cst_123 : f32 to vector<4x1xf32>
    %cst_124 = arith.constant 0.000000e+00 : f32
    %460 = vector.broadcast %cst_124 : f32 to vector<4x32xf32>
    %461 = vector.extract_strided_slice %439 {offsets = [0, 0], sizes = [4, 1], strides = [1, 1]} : vector<40x1xf32> to vector<4x1xf32>
    %462 = arith.subf %461, %458 : vector<4x1xf32>
    %463 = math.exp %462 : vector<4x1xf32>
    %464 = arith.addf %459, %463 : vector<4x1xf32>
    %465 = vector.extract_strided_slice %426 {offsets = [0, 0], sizes = [4, 32], strides = [1, 1]} : vector<40x32xf32> to vector<4x32xf32>
    %466 = vector.broadcast %463 : vector<4x1xf32> to vector<4x32xf32>
    %467 = arith.mulf %465, %466 : vector<4x32xf32>
    %468 = arith.addf %460, %467 : vector<4x32xf32>
    %469 = vector.extract_strided_slice %439 {offsets = [4, 0], sizes = [4, 1], strides = [1, 1]} : vector<40x1xf32> to vector<4x1xf32>
    %470 = arith.subf %469, %458 : vector<4x1xf32>
    %471 = math.exp %470 : vector<4x1xf32>
    %472 = arith.addf %464, %471 : vector<4x1xf32>
    %473 = vector.extract_strided_slice %426 {offsets = [4, 0], sizes = [4, 32], strides = [1, 1]} : vector<40x32xf32> to vector<4x32xf32>
    %474 = vector.broadcast %471 : vector<4x1xf32> to vector<4x32xf32>
    %475 = arith.mulf %473, %474 : vector<4x32xf32>
    %476 = arith.addf %468, %475 : vector<4x32xf32>
    %477 = vector.extract_strided_slice %439 {offsets = [8, 0], sizes = [4, 1], strides = [1, 1]} : vector<40x1xf32> to vector<4x1xf32>
    %478 = arith.subf %477, %458 : vector<4x1xf32>
    %479 = math.exp %478 : vector<4x1xf32>
    %480 = arith.addf %472, %479 : vector<4x1xf32>
    %481 = vector.extract_strided_slice %426 {offsets = [8, 0], sizes = [4, 32], strides = [1, 1]} : vector<40x32xf32> to vector<4x32xf32>
    %482 = vector.broadcast %479 : vector<4x1xf32> to vector<4x32xf32>
    %483 = arith.mulf %481, %482 : vector<4x32xf32>
    %484 = arith.addf %476, %483 : vector<4x32xf32>
    %485 = vector.extract_strided_slice %439 {offsets = [12, 0], sizes = [4, 1], strides = [1, 1]} : vector<40x1xf32> to vector<4x1xf32>
    %486 = arith.subf %485, %458 : vector<4x1xf32>
    %487 = math.exp %486 : vector<4x1xf32>
    %488 = arith.addf %480, %487 : vector<4x1xf32>
    %489 = vector.extract_strided_slice %426 {offsets = [12, 0], sizes = [4, 32], strides = [1, 1]} : vector<40x32xf32> to vector<4x32xf32>
    %490 = vector.broadcast %487 : vector<4x1xf32> to vector<4x32xf32>
    %491 = arith.mulf %489, %490 : vector<4x32xf32>
    %492 = arith.addf %484, %491 : vector<4x32xf32>
    %493 = vector.extract_strided_slice %439 {offsets = [16, 0], sizes = [4, 1], strides = [1, 1]} : vector<40x1xf32> to vector<4x1xf32>
    %494 = arith.subf %493, %458 : vector<4x1xf32>
    %495 = math.exp %494 : vector<4x1xf32>
    %496 = arith.addf %488, %495 : vector<4x1xf32>
    %497 = vector.extract_strided_slice %426 {offsets = [16, 0], sizes = [4, 32], strides = [1, 1]} : vector<40x32xf32> to vector<4x32xf32>
    %498 = vector.broadcast %495 : vector<4x1xf32> to vector<4x32xf32>
    %499 = arith.mulf %497, %498 : vector<4x32xf32>
    %500 = arith.addf %492, %499 : vector<4x32xf32>
    %501 = vector.extract_strided_slice %439 {offsets = [20, 0], sizes = [4, 1], strides = [1, 1]} : vector<40x1xf32> to vector<4x1xf32>
    %502 = arith.subf %501, %458 : vector<4x1xf32>
    %503 = math.exp %502 : vector<4x1xf32>
    %504 = arith.addf %496, %503 : vector<4x1xf32>
    %505 = vector.extract_strided_slice %426 {offsets = [20, 0], sizes = [4, 32], strides = [1, 1]} : vector<40x32xf32> to vector<4x32xf32>
    %506 = vector.broadcast %503 : vector<4x1xf32> to vector<4x32xf32>
    %507 = arith.mulf %505, %506 : vector<4x32xf32>
    %508 = arith.addf %500, %507 : vector<4x32xf32>
    %509 = vector.extract_strided_slice %439 {offsets = [24, 0], sizes = [4, 1], strides = [1, 1]} : vector<40x1xf32> to vector<4x1xf32>
    %510 = arith.subf %509, %458 : vector<4x1xf32>
    %511 = math.exp %510 : vector<4x1xf32>
    %512 = arith.addf %504, %511 : vector<4x1xf32>
    %513 = vector.extract_strided_slice %426 {offsets = [24, 0], sizes = [4, 32], strides = [1, 1]} : vector<40x32xf32> to vector<4x32xf32>
    %514 = vector.broadcast %511 : vector<4x1xf32> to vector<4x32xf32>
    %515 = arith.mulf %513, %514 : vector<4x32xf32>
    %516 = arith.addf %508, %515 : vector<4x32xf32>
    %517 = vector.extract_strided_slice %439 {offsets = [28, 0], sizes = [4, 1], strides = [1, 1]} : vector<40x1xf32> to vector<4x1xf32>
    %518 = arith.subf %517, %458 : vector<4x1xf32>
    %519 = math.exp %518 : vector<4x1xf32>
    %520 = arith.addf %512, %519 : vector<4x1xf32>
    %521 = vector.extract_strided_slice %426 {offsets = [28, 0], sizes = [4, 32], strides = [1, 1]} : vector<40x32xf32> to vector<4x32xf32>
    %522 = vector.broadcast %519 : vector<4x1xf32> to vector<4x32xf32>
    %523 = arith.mulf %521, %522 : vector<4x32xf32>
    %524 = arith.addf %516, %523 : vector<4x32xf32>
    %525 = vector.extract_strided_slice %439 {offsets = [32, 0], sizes = [4, 1], strides = [1, 1]} : vector<40x1xf32> to vector<4x1xf32>
    %526 = arith.subf %525, %458 : vector<4x1xf32>
    %527 = math.exp %526 : vector<4x1xf32>
    %528 = arith.addf %520, %527 : vector<4x1xf32>
    %529 = vector.extract_strided_slice %426 {offsets = [32, 0], sizes = [4, 32], strides = [1, 1]} : vector<40x32xf32> to vector<4x32xf32>
    %530 = vector.broadcast %527 : vector<4x1xf32> to vector<4x32xf32>
    %531 = arith.mulf %529, %530 : vector<4x32xf32>
    %532 = arith.addf %524, %531 : vector<4x32xf32>
    %533 = vector.extract_strided_slice %439 {offsets = [36, 0], sizes = [4, 1], strides = [1, 1]} : vector<40x1xf32> to vector<4x1xf32>
    %534 = arith.subf %533, %458 : vector<4x1xf32>
    %535 = math.exp %534 : vector<4x1xf32>
    %536 = arith.addf %528, %535 : vector<4x1xf32>
    %537 = vector.extract_strided_slice %426 {offsets = [36, 0], sizes = [4, 32], strides = [1, 1]} : vector<40x32xf32> to vector<4x32xf32>
    %538 = vector.broadcast %535 : vector<4x1xf32> to vector<4x32xf32>
    %539 = arith.mulf %537, %538 : vector<4x32xf32>
    %540 = arith.addf %532, %539 : vector<4x32xf32>
    %541 = tpu.reciprocal %536 {approx = true} : vector<4x1xf32> -> vector<4x1xf32>
    %542 = vector.broadcast %541 : vector<4x1xf32> to vector<4x32xf32>
    %543 = arith.mulf %540, %542 : vector<4x32xf32>
    %c0_125 = arith.constant 0 : index
    %c0_126 = arith.constant 0 : index
    %544 = vector.load %arg10[%c0_125, %c0_126] : memref<32x8xf32, #tpu.memory_space<vmem>>, vector<32x8xf32>
    %cst_127 = arith.constant dense<0.000000e+00> : vector<4x8xf32>
    %545 = tpu.matmul %543, %544, %cst_127 {dimension_numbers = #tpu.dot_dimension_numbers<[1], [0], [0], [1], [0, 0, 1, 1], [], []>} : vector<4x32xf32>, vector<32x8xf32>, vector<4x8xf32> -> vector<4x8xf32>
    %c0_128 = arith.constant 0 : index
    %c0_129 = arith.constant 0 : index
    %546 = vector.load %arg11[%c0_128, %c0_129] : memref<1x8xf32, #tpu.memory_space<vmem>>, vector<1x8xf32>
    %547 = vector.broadcast %546 : vector<1x8xf32> to vector<4x8xf32>
    %548 = arith.addf %545, %547 : vector<4x8xf32>
    %cst_130 = arith.constant dense<0xFF800000> : vector<4xf32>
    %549 = vector.multi_reduction <maximumf>, %548, %cst_130 [1] : vector<4x8xf32> to vector<4xf32>
    %550 = vector.shape_cast %549 : vector<4xf32> to vector<4x1xf32>
    %551 = vector.broadcast %550 : vector<4x1xf32> to vector<4x8xf32>
    %552 = arith.subf %548, %551 : vector<4x8xf32>
    %553 = math.exp %552 : vector<4x8xf32>
    %cst_131 = arith.constant dense<0.000000e+00> : vector<4xf32>
    %554 = vector.multi_reduction <add>, %553, %cst_131 [1] : vector<4x8xf32> to vector<4xf32>
    %555 = vector.shape_cast %554 : vector<4xf32> to vector<4x1xf32>
    %556 = math.log %555 : vector<4x1xf32>
    %557 = arith.addf %556, %550 : vector<4x1xf32>
    %558 = vector.broadcast %557 : vector<4x1xf32> to vector<4x8xf32>
    %559 = arith.subf %548, %558 : vector<4x8xf32>
    %c0_132 = arith.constant 0 : index
    %c0_133 = arith.constant 0 : index
    %560 = vector.load %arg12[%c0_132, %c0_133] : memref<4x8xf32, #tpu.memory_space<vmem>>, vector<4x8xf32>
    tpu.vector_store %arg12[%c0_132, %c0_133], %559 {strides = array<i32>} : memref<4x8xf32, #tpu.memory_space<vmem>>, vector<4x8xf32>,
    return
  }
}

</mosaic_0001>

<bundles_post_ra>
// kernel: rnn_attention_pallas.1
= control target key start
LH: loop header
LB: loop body
LE: loop exit
PB: predicated region body
PF: predicated region fallthrough
CT: control target
= control target key end

     0   :  { %s3315_s0 = inlined_call_operand.vmem [shape: s32[40,1], index: 0, kind: input, shape index: {}]   ;;  %s3316_s1 = inlined_call_operand.vmem [shape: f32[50,16], index: 1, kind: input, shape index: {}]   ;;  %s3317_s2 = inlined_call_operand.vmem [shape: f32[16,96], index: 2, kind: input, shape index: {}]   ;;  %s3318_s3 = inlined_call_operand.vmem [shape: f32[32,96], index: 3, kind: input, shape index: {}]   ;;  %s3319_s4 = inlined_call_operand.vmem [shape: f32[1,96], index: 4, kind: input, shape index: {}]   ;;  %s3320_s5 = inlined_call_operand.vmem [shape: f32[1,96], index: 5, kind: input, shape index: {}]   ;;  %s3321_s6 = inlined_call_operand.vmem [shape: f32[32,32], index: 6, kind: input, shape index: {}]   ;;  %s3322_s7 = inlined_call_operand.vmem [shape: f32[1,32], index: 7, kind: input, shape index: {}]   ;;  %s3323_s8 = inlined_call_operand.vmem [shape: f32[32,1], index: 8, kind: input, shape index: {}]   ;;  %s3324_s9 = inlined_call_operand.<no memory space> [shape: f32[1,1], index: 9, kind: input, shape index: {}]   ;;  %s3325_s10 = inlined_call_operand.vmem [shape: f32[32,8], index: 10, kind: input, shape index: {}]   ;;  %s3326_s11 = inlined_call_operand.vmem [shape: f32[1,8], index: 11, kind: input, shape index: {}]   ;;  %s3327_s12 = inlined_call_operand.hbm [shape: f32[4,8], index: 12, kind: output, shape index: {}]  }
   0x1   :  { %v17_v0 = vstv %s3324_s9 }
   0x2   :  { %18 = vst [vmem:[#allocation3] sm:$0x1] %v17_v0 }
   0x3   :  { %v2794_v1 = vld [vmem:[%s3315_s0] sm:$0xff]  ;;  %v2799_v2 = vld [vmem:[%s3315_s0 + $0x10] sm:$0xff]  ;;  %v2715_v3 = vmov 0   ;;  %v87_v5 = vld [vmem:[%s3316_s1 + $0x8] sm:$0xff]  ;;  %v2716_v10 = vmov 0.0|0.0   ;;  %vm2717_vm0 = vmmov 0  }
   0x4   :  { %2593 = vset.pattern.permute.xlu0 %v2715_v3  ;;  %2594 = vset.pattern.permute.xlu1 %v2715_v3  ;;  %v86_v4 = vld [vmem:[%s3316_s1] sm:$0xff]  ;;  %v88_v6 = vld [vmem:[%s3316_s1 + $0x10] sm:$0xff]  ;;  %v89_v7 = vld [vmem:[%s3316_s1 + $0x18] sm:$0xff]  ;;  %v2718_v12 = vmov 0.0  }
   0x5   :  { %57 = vperm.xlu0 %2593, %v2794_v1   ;;  %63 = vperm.xlu1 %2594, %v2799_v2   ;;  %v2820_v8 = vld [vmem:[%s3315_s0 + $0x8] sm:$0xff]  ;;  %v2825_v9 = vld [vmem:[%s3315_s0 + $0x18] sm:$0xff]  ;;  %v2496_v11 = vpack.c.bf16 %v87_v5, %v86_v4 }
   0x6   :  { %2495 = vmatprep.subr.bf16.mxu0 %v2716_v10  ;;  %2294 = vmatprep.mubr.msk.f32.mxu0 %vm2717_vm0, %v2718_v12 }
   0x7   :  { %2504 = vmatprep.subr.bf16.mxu1 %v2716_v10  ;;  %2313 = vmatprep.mubr.msk.f32.mxu1 %vm2717_vm0, %v2718_v12 }
   0x8   :  { %19 = vsyncpa [#allocation5], 0  ;;  %2497 = vmatpush3.bf16.msra.mxu0 %v2496_v11  ;;  %v2499_v13 = vpack.c.bf16 %v89_v7, %v88_v6  ;;  %v90_v14 = vld [vmem:[%s3316_s1 + $0x20] sm:$0xff]  ;;  %v91_v15 = vld [vmem:[%s3316_s1 + $0x28] sm:$0xff]  ;;  %vm109_vm1 = vcmask 1041408   ;;  %v54_v22 = vlaneseq  ;;  %vm93_vm2 = vcmask 408576  }
   0x9   :  { %60 = vperm.xlu0 %2593, %v2820_v8   ;;  %66 = vperm.xlu1 %2594, %v2825_v9   ;;  %v2844_v16 = vld [vmem:[%s3315_s0 + $0x20] sm:$0xff]  ;;  %v2502_v17 = vpack.c.bf16 %v91_v15, %v90_v14  ;;  %v92_v18 = vld [vmem:[%s3316_s1 + $0x30] sm:$0x3]  ;;  %v204_v20 = vld [vmem:[%s3317_s2 + $0x8] sm:$0xff]  ;;  %vm212_vm8 = vcmask 130048   ;;  %vm49_vm9 = vcmp.eq.s32.totalorder %v2794_v1, 0 }
   0xa   :  { %2498 = vmatprep.subr.bf16.mxu0 %v2716_v10  ;;  %v203_v19 = vld [vmem:[%s3317_s2] sm:$0xff]  ;;  %v55_v23 = vand.u32 127, %v54_v22  ;;  %v319_v35 = vld [vmem:[%s3318_s3 + $0x8] sm:$0xff]  ;;  %v320_v37 = vld [vmem:[%s3318_s3 + $0x10] sm:$0xff]  ;;  %v429_v11 = vsel %vm49_vm9, 1, %v2715_v3  ;;  %vm439_vm11 = vcmask 257024  }
   0xb   :  { %v2505_v21 = vpack.c.bf16 %v204_v20, %v203_v19  ;;  %v318_v34 = vld [vmem:[%s3318_s3] sm:$0xff]  ;;  %v321_v38 = vld [vmem:[%s3318_s3 + $0x18] sm:$0xff]  ;;  %vm329_vm12 = vcmask 261120   ;;  %s2721_s21 = smov 32   ;;  %vm50_vm13 = vcmp.eq.s32.totalorder %v2820_v8, 0  ;;  %vm51_vm15 = vcmp.eq.s32.totalorder %v2799_v2, 0 }
   0xc   :  { %2500 = vmatpush3.bf16.msra.mxu0 %v2499_v13  ;;  %v2887_v36 = vpack.c.bf16 %v319_v35, %v318_v34  ;;  %v2897_v39 = vpack.c.bf16 %v321_v38, %v320_v37  ;;  %v2139_v52 = vld [vmem:[%s3319_s4] ss:$0 sm:$0xff]  ;;  %s2719_s4 = smov 64  }
   0xd   :  { %69 = vperm.xlu0 %2593, %v2844_v16   ;;  %2501 = vmatprep.subr.bf16.mxu0 %v2716_v10  ;;  %v2941_v4 = vld [vmem:[%s3320_s5] ss:$0 sm:$0xff]  ;;  %s2720_s5 = smov 96  }
   0xe   :  { %2506 = vmatpush3.bf16.msra.mxu1 %v2505_v21 }
   0xf   :  { %2507 = vmatprep.subr.bf16.mxu1 %v2716_v10 }
  0x10   :  { %2503 = vmatpush3.bf16.msra.mxu0 %v2502_v17 }
  0x11   :  { %2292 = vmatprep.subr.mxu0 %v2718_v12 }
  0x14   :  { %2293 = vmatpush3.msk.msra.mxu0 %vm109_vm1, %v92_v18 }
  0x15   :  { %2519 = vmatprep.subr.bf16.mxu0 %v2716_v10 }
  0x84   :  { %v58_v24 = vpop.permute.xlu0 %57  ;;  %v64_v26 = vpop.permute.xlu1 %63 }
  0x85   :  { %vm71_vm3 = vcmp.eq.s32.totalorder %v58_v24, %v55_v23  ;;  %vm73_vm4 = vcmp.eq.s32.totalorder %v64_v26, %v55_v23 }
  0x86   :  { %v2128_v25 = vsel %vm71_vm3, 1.0, %v2718_v12  ;;  %v2130_v29 = vsel %vm73_vm4, 1.0, %v2718_v12  ;;  %vm53_vm4 = vcmp.eq.s32.totalorder %v2844_v16, 0 }
  0x87   :  { %2295 = vmatmul.mubr.msk.f32.vlgmr.msra.gmra.mrb[0].mxu0 %vm93_vm2, %v2128_v25 }
  0x88   :  { %v61_v27 = vpop.permute.xlu0 %60  ;;  %2297 = vmatprep.mubr.msk.f32.mxu0 %vm2717_vm0, %v2718_v12  ;;  %v67_v30 = vpop.permute.xlu1 %66  ;;  %2521 = vmatpush3.bf16.msra.mxu0 %v2887_v36 }
  0x89   :  { %vm72_vm5 = vcmp.eq.s32.totalorder %v61_v27, %v55_v23  ;;  %vm74_vm6 = vcmp.eq.s32.totalorder %v67_v30, %v55_v23  ;;  %2522 = vmatprep.subr.bf16.mxu0 %v2716_v10 }
  0x8a   :  { %v2129_v28 = vsel %vm72_vm5, 1.0, %v2718_v12  ;;  %v2131_v32 = vsel %vm74_vm6, 1.0, %v2718_v12  ;;  %vm567_vm6 = vcmask 261124  }
  0x8b   :  { %2298 = vmatmul.mubr.msk.f32.gmra.mrb[2].mxu0 %vm93_vm2, %v2129_v28 }
  0x8c   :  { %2300 = vmatprep.mubr.msk.f32.mxu0 %vm2717_vm0, %v2718_v12  ;;  %v70_v31 = vpop.permute.xlu0 %69  ;;  %2524 = vmatpush3.bf16.msra.mxu0 %v2897_v39 }
  0x8d   :  { %vm75_vm7 = vcmp.eq.s32.totalorder %v70_v31, %v55_v23  ;;  %2531 = vmatprep.subr.bf16.mxu0 %v2716_v10 }
  0x8e   :  { %v2132_v33 = vsel %vm75_vm7, 1.0, %v2718_v12 }
  0x8f   :  { %2301 = vmatmul.mubr.msk.f32.gmra.mrb[4].mxu0 %vm93_vm2, %v2130_v29 }
  0x90   :  { %2303 = vmatprep.mubr.msk.f32.mxu0 %vm2717_vm0, %v2718_v12 }
  0x93   :  { %2304 = vmatmul.mubr.msk.f32.gmra.mrb[6].mxu0 %vm93_vm2, %v2131_v32 }
  0x94   :  { %2306 = vmatprep.mubr.msk.f32.mxu0 %vm2717_vm0, %v2718_v12 }
  0x97   :  { %2307 = vmatmul.mubr.msk.f32.gmra.mrb[8].mxu0 %vm93_vm2, %v2132_v33  ;;  %vm52_vm2 = vcmp.eq.s32.totalorder %v2825_v9, 0 }
  0x98   :  { %2358 = vmatprep.mubr.msk.f32.mxu0 %vm2717_vm0, %v2718_v12 }
 0x15a   :  { %v179_v40 = vpop.f32.mrb[0].mxu0 }
 0x15b   :  { %v2296_v41 = vpop.f32.mrb[1].mxu0  ;;  %2314 = vmatmul.mubr.msk.f32.vlgmr.msra.gmra.mrb[0].mxu1 %vm212_vm8, %v179_v40 }
 0x15c   :  { %2509 = vmatpush3.bf16.msra.mxu1 %v2887_v36  ;;  %2316 = vmatprep.mubr.msk.f32.mxu1 %vm2717_vm0, %v2718_v12 }
 0x15d   :  { %2510 = vmatprep.subr.bf16.mxu1 %v2716_v10 }
 0x15e   :  { %v184_v42 = vpop.f32.mrb[2].mxu0 }
 0x15f   :  { %v2299_v43 = vpop.f32.mrb[3].mxu0  ;;  %2317 = vmatmul.mubr.msk.f32.gmra.mrb[2].mxu1 %vm212_vm8, %v184_v42 }
 0x160   :  { %2319 = vmatprep.mubr.msk.f32.mxu1 %vm2717_vm0, %v2718_v12  ;;  %2512 = vmatpush3.bf16.msra.mxu1 %v2897_v39 }
 0x161   :  { %2513 = vmatprep.subr.bf16.mxu1 %v2716_v10 }
 0x162   :  { %v189_v44 = vpop.f32.mrb[4].mxu0 }
 0x163   :  { %v2302_v45 = vpop.f32.mrb[5].mxu0  ;;  %2320 = vmatmul.mubr.msk.f32.gmra.mrb[4].mxu1 %vm212_vm8, %v189_v44 }
 0x164   :  { %2322 = vmatprep.mubr.msk.f32.mxu1 %vm2717_vm0, %v2718_v12 }
 0x166   :  { %v194_v46 = vpop.f32.mrb[6].mxu0 }
 0x167   :  { %v2305_v47 = vpop.f32.mrb[7].mxu0  ;;  %2323 = vmatmul.mubr.msk.f32.gmra.mrb[6].mxu1 %vm212_vm8, %v194_v46 }
 0x168   :  { %2325 = vmatprep.mubr.msk.f32.mxu1 %vm2717_vm0, %v2718_v12 }
 0x16a   :  { %v199_v48 = vpop.f32.mrb[8].mxu0 }
 0x16b   :  { %v2308_v49 = vpop.f32.mrb[9].mxu0  ;;  %2326 = vmatmul.mubr.msk.f32.gmra.mrb[8].mxu1 %vm212_vm8, %v199_v48 }
 0x16c   :  { %2336 = vmatprep.mubr.msk.f32.mxu1 %vm2717_vm0, %v2718_v12 }
 0x16f   :  { %2337 = vmatmul.mubr.f32.vlgmr.msra.gmra.mrb[10].mxu1 %v2718_v12 }
 0x170   :  { %2515 = vmatpush3.bf16.msra.mxu1 %v2887_v36  ;;  %2347 = vmatprep.mubr.msk.f32.mxu1 %vm2717_vm0, %v2718_v12 }
 0x171   :  { %2516 = vmatprep.subr.bf16.mxu1 %v2716_v10 }
 0x174   :  { %2518 = vmatpush3.bf16.msra.mxu1 %v2897_v39 }
 0x175   :  { %2525 = vmatprep.subr.bf16.mxu1 %v2716_v10 }
 0x22e   :  { %v294_v50 = vpop.f32.mrb[0].mxu1 }
 0x22f   :  { %v2315_v51 = vpop.f32.mrb[1].mxu1  ;;  %v295_v13 = vadd.f32 %v2139_v52, %v294_v50 }
 0x232   :  { %v299_v53 = vpop.f32.mrb[2].mxu1 }
 0x233   :  { %v2930_v54 = vadd.f32 %v2139_v52, %v299_v53  ;;  %v2318_v55 = vpop.f32.mrb[3].mxu1 }
 0x236   :  { %v304_v56 = vpop.f32.mrb[4].mxu1 }
 0x237   :  { %v2932_v57 = vadd.f32 %v2139_v52, %v304_v56  ;;  %v2321_v58 = vpop.f32.mrb[5].mxu1 }
 0x23a   :  { %v309_v59 = vpop.f32.mrb[6].mxu1 }
 0x23b   :  { %v2934_v60 = vadd.f32 %v2139_v52, %v309_v59  ;;  %v2324_v61 = vpop.f32.mrb[7].mxu1 }
 0x23e   :  { %v314_v62 = vpop.f32.mrb[8].mxu1 }
 0x23f   :  { %v2936_v63 = vadd.f32 %v2139_v52, %v314_v62  ;;  %v2327_v0 = vpop.f32.mrb[9].mxu1 }
 0x242   :  { %v399_v5 = vpop.f32.mrb[10].mxu1 }
 0x243   :  { %v400_v6 = vadd.f32 %v2941_v4, %v399_v5  ;;  %v2338_v7 = vpop.f32.mrb[11].mxu1 }
 0x245   :  { %411 = vrot.lane.b32.xlu1 %v400_v6, %s2719_s4  ;;  %v403_v14 = vadd.f32 %v400_v6, %v295_v13 }
 0x247   :  { %v2146_v15 = vmul.f32 -1.442695, %v403_v14 }
 0x249   :  { %431 = vperm.xlu1 %2594, %v429_v11   ;;  %2595 = vpow2.f32 %v2146_v15 }
 0x253   :  { %v2596_v17 = vpop.eup %2595 }
 0x254   :  { %v407_v18 = vadd.f32 1.0, %v2596_v17 }
 0x256   :  { %2597 = vrcp.f32 %v407_v18 }
 0x260   :  { %v2598_v19 = vpop.eup %2597 }
 0x261   :  { %v421_v25 = vsub.f32 1.0, %v2598_v19  ;;  %v427_v28 = vmul.f32 0.0, %v2598_v19 }
 0x2b7   :  { %v412_v20 = vpop.permute.xlu1 %411 }
 0x2b8   :  { %v414_v21 = vmul.f32 %v2598_v19, %v412_v20 }
 0x2ba   :  { %416 = vrot.lane.b32.xlu0 %v414_v21, %s2719_s4  ;;  %v683_v21 = vsel %vm50_vm13, 1, %v2715_v3 }
 0x2c8   :  { %v2951_v27 = vpop.permute.xlu1 %431 }
 0x2c9   :  { %vm433_vm10 = vcmp.eq.s32.totalorder %v2951_v27, 1 }
 0x32c   :  { %v417_v22 = vpop.permute.xlu0 %416 }
 0x32d   :  { %v419_v23 = vadd.f32 %v417_v22, %v295_v13 }
 0x32f   :  { %2599 = vtanh.f32 %v419_v23 }
 0x339   :  { %v2600_v24 = vpop.eup %2599 }
 0x33a   :  { %423 = vrot.lane.b32.xlu0 %v2600_v24, %s2720_s5 }
 0x3ac   :  { %v424_v26 = vpop.permute.xlu0 %423 }
 0x3ad   :  { %v426_v29 = vmul.f32 %v424_v26, %v421_v25 }
 0x3af   :  { %v428_v30 = vadd.f32 %v427_v28, %v426_v29 }
 0x3b1   :  { %v434_v31 = vsel %vm433_vm10, 0.0, %v428_v30 }
 0x3b2   :  { %436 = vrot.lane.b32.xlu1 %v434_v31, %s2720_s5  ;;  %v550_v46 = vrot.slane %v434_v31, 4 }
 0x424   :  { %v437_v32 = vpop.permute.xlu1 %436 }
 0x425   :  { %440 = vst.msk [vmem:[#allocation2] sm:$0xf] %vm439_vm11, %v437_v32  ;;  %2348 = vmatmul.mubr.msk.f32.vlgmr.msra.gmra.mrb[12].mxu1 %vm329_vm12, %v437_v32 }
 0x426   :  { %2527 = vmatpush3.bf16.msra.mxu1 %v2887_v36  ;;  %2369 = vmatprep.mubr.msk.f32.mxu1 %vm2717_vm0, %v2718_v12 }
 0x427   :  { %2528 = vmatprep.subr.bf16.mxu1 %v2716_v10 }
 0x42a   :  { %2530 = vmatpush3.bf16.msra.mxu1 %v2897_v39 }
 0x42b   :  { %2537 = vmatprep.subr.bf16.mxu1 %v2716_v10 }
 0x4f8   :  { %v520_v33 = vpop.f32.mrb[12].mxu1 }
 0x4f9   :  { %v521_v34 = vadd.f32 %v2941_v4, %v520_v33  ;;  %v2349_v35 = vpop.f32.mrb[13].mxu1 }
 0x4fb   :  { %v525_v37 = vrot.slane %v521_v34, 4 }
 0x4fd   :  { %534 = vrot.lane.b32.xlu0 %v525_v37, %s2719_s4  ;;  %v527_v38 = vadd.f32 %v525_v37, %v295_v13 }
 0x4ff   :  { %v2149_v40 = vmul.f32 -1.442695, %v527_v38 }
 0x501   :  { %2601 = vpow2.f32 %v2149_v40 }
 0x50b   :  { %v2602_v41 = vpop.eup %2601 }
 0x50c   :  { %v531_v42 = vadd.f32 1.0, %v2602_v41 }
 0x50e   :  { %2603 = vrcp.f32 %v531_v42 }
 0x518   :  { %v2604_v43 = vpop.eup %2603 }
 0x519   :  { %v544_v50 = vsub.f32 1.0, %v2604_v43  ;;  %v552_v53 = vmul.f32 %v2604_v43, %v550_v46 }
 0x56f   :  { %v535_v44 = vpop.permute.xlu0 %534 }
 0x570   :  { %v537_v45 = vmul.f32 %v2604_v43, %v535_v44 }
 0x572   :  { %539 = vrot.lane.b32.xlu1 %v537_v45, %s2719_s4 }
 0x576   :  { %554 = vrot.lane.b32.xlu1 %v550_v46, %s2720_s5 }
 0x5e4   :  { %v540_v47 = vpop.permute.xlu1 %539 }
 0x5e5   :  { %v542_v48 = vadd.f32 %v540_v47, %v295_v13 }
 0x5e7   :  { %2605 = vtanh.f32 %v542_v48 }
 0x5e8   :  { %v555_v56 = vpop.permute.xlu1 %554 }
 0x5f1   :  { %v2606_v49 = vpop.eup %2605 }
 0x5f2   :  { %546 = vrot.lane.b32.xlu0 %v2606_v49, %s2720_s5 }
 0x664   :  { %v547_v51 = vpop.permute.xlu0 %546 }
 0x665   :  { %v549_v52 = vmul.f32 %v547_v51, %v544_v50 }
 0x667   :  { %v2970_v55 = vadd.f32 %v552_v53, %v549_v52 }
 0x669   :  { %558 = vrot.lane.b32.xlu0 %v2970_v55, %s2720_s5 }
 0x6db   :  { %v559_v58 = vpop.permute.xlu0 %558 }
 0x6dc   :  { %v561_v59 = vsel %vm433_vm10, %v555_v56, %v559_v58 }
 0x6dd   :  { %v581_v61 = vrot.slane %v561_v59, 4 }
 0x6df   :  { %2359 = vmatmul.mubr.msk.f32.vlgmr.msra.gmra.mrb[10].mxu0 %vm329_vm12, %v581_v61 }
 0x6e0   :  { %2533 = vmatpush3.bf16.msra.mxu0 %v2887_v36  ;;  %2380 = vmatprep.mubr.msk.f32.mxu0 %vm2717_vm0, %v2718_v12 }
 0x6e1   :  { %2534 = vmatprep.subr.bf16.mxu0 %v2716_v10 }
 0x6e4   :  { %2536 = vmatpush3.bf16.msra.mxu0 %v2897_v39 }
 0x6e5   :  { %2543 = vmatprep.subr.bf16.mxu0 %v2716_v10 }
 0x7b2   :  { %v650_v62 = vpop.f32.mrb[10].mxu0 }
 0x7b3   :  { %v651_v0 = vadd.f32 %v2941_v4, %v650_v62  ;;  %v2360_v5 = vpop.f32.mrb[11].mxu0 }
 0x7b5   :  { %662 = vrot.lane.b32.xlu1 %v651_v0, %s2719_s4  ;;  %v654_v6 = vadd.f32 %v651_v0, %v2930_v54 }
 0x7b7   :  { %v2152_v7 = vmul.f32 -1.442695, %v654_v6 }
 0x7b9   :  { %2607 = vpow2.f32 %v2152_v7 }
 0x7c3   :  { %v2608_v11 = vpop.eup %2607 }
 0x7c4   :  { %v658_v13 = vadd.f32 1.0, %v2608_v11 }
 0x7c6   :  { %2609 = vrcp.f32 %v658_v13 }
 0x7d0   :  { %v2610_v14 = vpop.eup %2609 }
 0x7d1   :  { %v672_v23 = vsub.f32 1.0, %v2610_v14 }
 0x827   :  { %v663_v15 = vpop.permute.xlu1 %662 }
 0x828   :  { %v665_v17 = vmul.f32 %v2610_v14, %v663_v15 }
 0x82a   :  { %667 = vrot.lane.b32.xlu0 %v665_v17, %s2719_s4 }
 0x82e   :  { %678 = vrot.lane.b32.xlu0 %v581_v61, %s2721_s21 }
 0x89c   :  { %v668_v18 = vpop.permute.xlu0 %667 }
 0x89d   :  { %v670_v19 = vadd.f32 %v668_v18, %v2930_v54 }
 0x89f   :  { %2611 = vtanh.f32 %v670_v19 }
 0x8a0   :  { %v679_v22 = vpop.permute.xlu0 %678 }
 0x8a1   :  { %v681_v25 = vmul.f32 %v2610_v14, %v679_v22 }
 0x8a9   :  { %v2612_v20 = vpop.eup %2611 }
 0x8aa   :  { %674 = vrot.lane.b32.xlu1 %v2612_v20, %s2720_s5  ;;  %v942_v20 = vsel %vm51_vm15, 1, %v2715_v3 }
 0x8ae   :  { %685 = vperm.xlu1 %2594, %v683_v21  }
 0x91c   :  { %v675_v24 = vpop.permute.xlu1 %674 }
 0x91d   :  { %v677_v26 = vmul.f32 %v675_v24, %v672_v23 }
 0x91f   :  { %v2994_v28 = vadd.f32 %v681_v25, %v677_v26 }
 0x921   :  { %690 = vrot.lane.b32.xlu0 %v2994_v28, %s2720_s5 }
 0x92d   :  { %v2998_v29 = vpop.permute.xlu1 %685 }
 0x92e   :  { %vm687_vm14 = vcmp.eq.s32.totalorder %v2998_v29, 1 }
 0x993   :  { %v691_v30 = vpop.permute.xlu0 %690 }
 0x994   :  { %v693_v31 = vsel %vm687_vm14, %v581_v61, %v691_v30 }
 0x995   :  { %2370 = vmatmul.mubr.msk.f32.vlgmr.msra.gmra.mrb[14].mxu1 %vm329_vm12, %v693_v31  ;;  %v810_v45 = vrot.slane %v693_v31, 4 }
 0x996   :  { %2539 = vmatpush3.bf16.msra.mxu1 %v2887_v36  ;;  %2391 = vmatprep.mubr.msk.f32.mxu1 %vm2717_vm0, %v2718_v12 }
 0x997   :  { %2540 = vmatprep.subr.bf16.mxu1 %v2716_v10 }
 0x99a   :  { %2542 = vmatpush3.bf16.msra.mxu1 %v2897_v39 }
 0x99b   :  { %2549 = vmatprep.subr.bf16.mxu1 %v2716_v10 }
 0xa68   :  { %v780_v32 = vpop.f32.mrb[14].mxu1 }
 0xa69   :  { %v781_v33 = vadd.f32 %v2941_v4, %v780_v32  ;;  %v2371_v34 = vpop.f32.mrb[15].mxu1 }
 0xa6b   :  { %v785_v35 = vrot.slane %v781_v33, 4 }
 0xa6d   :  { %794 = vrot.lane.b32.xlu1 %v785_v35, %s2719_s4  ;;  %v787_v37 = vadd.f32 %v785_v35, %v2930_v54 }
 0xa6f   :  { %v2155_v38 = vmul.f32 -1.442695, %v787_v37 }
 0xa71   :  { %2613 = vpow2.f32 %v2155_v38 }
 0xa7b   :  { %v2614_v40 = vpop.eup %2613 }
 0xa7c   :  { %v791_v41 = vadd.f32 1.0, %v2614_v40 }
 0xa7e   :  { %2615 = vrcp.f32 %v791_v41 }
 0xa88   :  { %v2616_v42 = vpop.eup %2615 }
 0xa89   :  { %v804_v50 = vsub.f32 1.0, %v2616_v42 }
 0xadf   :  { %v795_v43 = vpop.permute.xlu1 %794 }
 0xae0   :  { %v797_v44 = vmul.f32 %v2616_v42, %v795_v43 }
 0xae2   :  { %799 = vrot.lane.b32.xlu0 %v797_v44, %s2719_s4 }
 0xae6   :  { %811 = vrot.lane.b32.xlu0 %v810_v45, %s2721_s21 }
 0xb54   :  { %v800_v46 = vpop.permute.xlu0 %799 }
 0xb55   :  { %v802_v47 = vadd.f32 %v800_v46, %v2930_v54 }
 0xb57   :  { %2617 = vtanh.f32 %v802_v47 }
 0xb58   :  { %v812_v49 = vpop.permute.xlu0 %811 }
 0xb59   :  { %v814_v52 = vmul.f32 %v2616_v42, %v812_v49 }
 0xb61   :  { %v2618_v48 = vpop.eup %2617 }
 0xb62   :  { %806 = vrot.lane.b32.xlu1 %v2618_v48, %s2720_s5 }
 0xbd4   :  { %v807_v51 = vpop.permute.xlu1 %806 }
 0xbd5   :  { %v809_v53 = vmul.f32 %v807_v51, %v804_v50 }
 0xbd7   :  { %v3017_v56 = vadd.f32 %v814_v52, %v809_v53 }
 0xbd9   :  { %818 = vrot.lane.b32.xlu1 %v3017_v56, %s2720_s5 }
 0xc4b   :  { %v819_v58 = vpop.permute.xlu1 %818 }
 0xc4c   :  { %v821_v59 = vsel %vm687_vm14, %v810_v45, %v819_v58 }
 0xc4d   :  { %v840_v61 = vrot.slane %v821_v59, 4 }
 0xc4f   :  { %2381 = vmatmul.mubr.msk.f32.vlgmr.msra.gmra.mrb[12].mxu0 %vm329_vm12, %v840_v61 }
 0xc50   :  { %2545 = vmatpush3.bf16.msra.mxu0 %v2887_v36  ;;  %2402 = vmatprep.mubr.msk.f32.mxu0 %vm2717_vm0, %v2718_v12 }
 0xc51   :  { %2546 = vmatprep.subr.bf16.mxu0 %v2716_v10 }
 0xc54   :  { %2548 = vmatpush3.bf16.msra.mxu0 %v2897_v39 }
 0xc55   :  { %2555 = vmatprep.subr.bf16.mxu0 %v2716_v10 }
 0xd22   :  { %v909_v54 = vpop.f32.mrb[12].mxu0 }
 0xd23   :  { %v910_v62 = vadd.f32 %v2941_v4, %v909_v54  ;;  %v2382_v0 = vpop.f32.mrb[13].mxu0 }
 0xd25   :  { %921 = vrot.lane.b32.xlu0 %v910_v62, %s2719_s4  ;;  %v913_v5 = vadd.f32 %v910_v62, %v2932_v57 }
 0xd27   :  { %v2158_v6 = vmul.f32 -1.442695, %v913_v5 }
 0xd29   :  { %2619 = vpow2.f32 %v2158_v6 }
 0xd33   :  { %v2620_v7 = vpop.eup %2619 }
 0xd34   :  { %v917_v11 = vadd.f32 1.0, %v2620_v7 }
 0xd36   :  { %2621 = vrcp.f32 %v917_v11 }
 0xd40   :  { %v2622_v13 = vpop.eup %2621 }
 0xd41   :  { %v931_v22 = vsub.f32 1.0, %v2622_v13 }
 0xd97   :  { %v922_v14 = vpop.permute.xlu0 %921 }
 0xd98   :  { %v924_v15 = vmul.f32 %v2622_v13, %v922_v14 }
 0xd9a   :  { %926 = vrot.lane.b32.xlu1 %v924_v15, %s2719_s4 }
 0xd9e   :  { %937 = vrot.lane.b32.xlu1 %v840_v61, %s2721_s21 }
 0xe0c   :  { %v927_v17 = vpop.permute.xlu1 %926 }
 0xe0d   :  { %v929_v18 = vadd.f32 %v927_v17, %v2932_v57 }
 0xe0f   :  { %2623 = vtanh.f32 %v929_v18 }
 0xe10   :  { %v938_v21 = vpop.permute.xlu1 %937 }
 0xe11   :  { %v940_v24 = vmul.f32 %v2622_v13, %v938_v21  ;;  %v1201_v21 = vsel %vm52_vm2, 1, %v2715_v3 }
 0xe19   :  { %v2624_v19 = vpop.eup %2623 }
 0xe1a   :  { %933 = vrot.lane.b32.xlu0 %v2624_v19, %s2720_s5 }
 0xe1e   :  { %944 = vperm.xlu0 %2593, %v942_v20  }
 0xe8c   :  { %v934_v23 = vpop.permute.xlu0 %933 }
 0xe8d   :  { %v936_v25 = vmul.f32 %v934_v23, %v931_v22 }
 0xe8f   :  { %v3041_v26 = vadd.f32 %v940_v24, %v936_v25 }
 0xe91   :  { %949 = vrot.lane.b32.xlu1 %v3041_v26, %s2720_s5 }
 0xe9d   :  { %v3045_v30 = vpop.permute.xlu0 %944 }
 0xe9e   :  { %vm946_vm1 = vcmp.eq.s32.totalorder %v3045_v30, 1 }
 0xf03   :  { %v950_v31 = vpop.permute.xlu1 %949 }
 0xf04   :  { %v952_v32 = vsel %vm946_vm1, %v840_v61, %v950_v31 }
 0xf05   :  { %2392 = vmatmul.mubr.msk.f32.vlgmr.msra.gmra.mrb[16].mxu1 %vm329_vm12, %v952_v32  ;;  %v1069_v46 = vrot.slane %v952_v32, 4 }
 0xf06   :  { %2551 = vmatpush3.bf16.msra.mxu1 %v2887_v36  ;;  %2413 = vmatprep.mubr.msk.f32.mxu1 %vm2717_vm0, %v2718_v12 }
 0xf07   :  { %2552 = vmatprep.subr.bf16.mxu1 %v2716_v10 }
 0xf0a   :  { %2554 = vmatpush3.bf16.msra.mxu1 %v2897_v39 }
 0xf0b   :  { %2561 = vmatprep.subr.bf16.mxu1 %v2716_v10 }
 0xfd8   :  { %v1039_v33 = vpop.f32.mrb[16].mxu1 }
 0xfd9   :  { %v1040_v34 = vadd.f32 %v2941_v4, %v1039_v33  ;;  %v2393_v35 = vpop.f32.mrb[17].mxu1 }
 0xfdb   :  { %v1044_v37 = vrot.slane %v1040_v34, 4 }
 0xfdd   :  { %1053 = vrot.lane.b32.xlu0 %v1044_v37, %s2719_s4  ;;  %v1046_v38 = vadd.f32 %v1044_v37, %v2932_v57 }
 0xfdf   :  { %v2161_v40 = vmul.f32 -1.442695, %v1046_v38 }
 0xfe1   :  { %2625 = vpow2.f32 %v2161_v40 }
 0xfeb   :  { %v2626_v41 = vpop.eup %2625 }
 0xfec   :  { %v1050_v42 = vadd.f32 1.0, %v2626_v41 }
 0xfee   :  { %2627 = vrcp.f32 %v1050_v42 }
 0xff8   :  { %v2628_v43 = vpop.eup %2627 }
 0xff9   :  { %v1063_v51 = vsub.f32 1.0, %v2628_v43 }
0x104f   :  { %v1054_v44 = vpop.permute.xlu0 %1053 }
0x1050   :  { %v1056_v45 = vmul.f32 %v2628_v43, %v1054_v44 }
0x1052   :  { %1058 = vrot.lane.b32.xlu1 %v1056_v45, %s2719_s4 }
0x1056   :  { %1070 = vrot.lane.b32.xlu1 %v1069_v46, %s2721_s21 }
0x10c4   :  { %v1059_v47 = vpop.permute.xlu1 %1058 }
0x10c5   :  { %v1061_v48 = vadd.f32 %v1059_v47, %v2932_v57 }
0x10c7   :  { %2629 = vtanh.f32 %v1061_v48 }
0x10c8   :  { %v1071_v50 = vpop.permute.xlu1 %1070 }
0x10c9   :  { %v1073_v53 = vmul.f32 %v2628_v43, %v1071_v50 }
0x10d1   :  { %v2630_v49 = vpop.eup %2629 }
0x10d2   :  { %1065 = vrot.lane.b32.xlu0 %v2630_v49, %s2720_s5 }
0x1144   :  { %v1066_v52 = vpop.permute.xlu0 %1065 }
0x1145   :  { %v1068_v58 = vmul.f32 %v1066_v52, %v1063_v51 }
0x1147   :  { %v3064_v59 = vadd.f32 %v1073_v53, %v1068_v58 }
0x1149   :  { %1077 = vrot.lane.b32.xlu0 %v3064_v59, %s2720_s5 }
0x11bb   :  { %v1078_v61 = vpop.permute.xlu0 %1077 }
0x11bc   :  { %v1080_v54 = vsel %vm946_vm1, %v1069_v46, %v1078_v61 }
0x11bd   :  { %v1099_v62 = vrot.slane %v1080_v54, 4 }
0x11bf   :  { %2403 = vmatmul.mubr.msk.f32.vlgmr.msra.gmra.mrb[14].mxu0 %vm329_vm12, %v1099_v62 }
0x11c0   :  { %2557 = vmatpush3.bf16.msra.mxu0 %v2887_v36  ;;  %2424 = vmatprep.mubr.msk.f32.mxu0 %vm2717_vm0, %v2718_v12 }
0x11c1   :  { %2558 = vmatprep.subr.bf16.mxu0 %v2716_v10 }
0x11c4   :  { %2560 = vmatpush3.bf16.msra.mxu0 %v2897_v39 }
0x11c5   :  { %2567 = vmatprep.subr.bf16.mxu0 %v2716_v10 }
0x1292   :  { %v1168_v57 = vpop.f32.mrb[14].mxu0 }
0x1293   :  { %v1169_v0 = vadd.f32 %v2941_v4, %v1168_v57  ;;  %v2404_v5 = vpop.f32.mrb[15].mxu0 }
0x1295   :  { %1180 = vrot.lane.b32.xlu1 %v1169_v0, %s2719_s4  ;;  %v1172_v6 = vadd.f32 %v1169_v0, %v2934_v60 }
0x1297   :  { %v2164_v7 = vmul.f32 -1.442695, %v1172_v6 }
0x1299   :  { %2631 = vpow2.f32 %v2164_v7 }
0x12a3   :  { %v2632_v11 = vpop.eup %2631 }
0x12a4   :  { %v1176_v13 = vadd.f32 1.0, %v2632_v11 }
0x12a6   :  { %2633 = vrcp.f32 %v1176_v13 }
0x12b0   :  { %v2634_v14 = vpop.eup %2633 }
0x12b1   :  { %v1190_v23 = vsub.f32 1.0, %v2634_v14 }
0x1307   :  { %v1181_v15 = vpop.permute.xlu1 %1180 }
0x1308   :  { %v1183_v17 = vmul.f32 %v2634_v14, %v1181_v15 }
0x130a   :  { %1185 = vrot.lane.b32.xlu0 %v1183_v17, %s2719_s4 }
0x130e   :  { %1196 = vrot.lane.b32.xlu0 %v1099_v62, %s2721_s21 }
0x137c   :  { %v1186_v18 = vpop.permute.xlu0 %1185 }
0x137d   :  { %v1188_v19 = vadd.f32 %v1186_v18, %v2934_v60 }
0x137f   :  { %2635 = vtanh.f32 %v1188_v19 }
0x1380   :  { %v1197_v22 = vpop.permute.xlu0 %1196 }
0x1381   :  { %v1199_v25 = vmul.f32 %v2634_v14, %v1197_v22  ;;  %v1460_v22 = vsel %vm53_vm4, 1, %v2715_v3 }
0x1389   :  { %v2636_v20 = vpop.eup %2635 }
0x138a   :  { %1192 = vrot.lane.b32.xlu1 %v2636_v20, %s2720_s5 }
0x138e   :  { %1203 = vperm.xlu1 %2594, %v1201_v21  }
0x13fc   :  { %v1193_v24 = vpop.permute.xlu1 %1192 }
0x13fd   :  { %v1195_v31 = vmul.f32 %v1193_v24, %v1190_v23 }
0x13ff   :  { %v3088_v32 = vadd.f32 %v1199_v25, %v1195_v31 }
0x1401   :  { %1208 = vrot.lane.b32.xlu0 %v3088_v32, %s2720_s5 }
0x140d   :  { %v3092_v33 = vpop.permute.xlu1 %1203 }
0x140e   :  { %vm1205_vm3 = vcmp.eq.s32.totalorder %v3092_v33, 1 }
0x1473   :  { %v1209_v34 = vpop.permute.xlu0 %1208 }
0x1474   :  { %v1211_v35 = vsel %vm1205_vm3, %v1099_v62, %v1209_v34 }
0x1475   :  { %2414 = vmatmul.mubr.msk.f32.vlgmr.msra.gmra.mrb[18].mxu1 %vm329_vm12, %v1211_v35 }
0x1476   :  { %2563 = vmatpush3.bf16.msra.mxu1 %v2887_v36  ;;  %2435 = vmatprep.mubr.msk.f32.mxu1 %vm2717_vm0, %v2718_v12 }
0x1477   :  { %2564 = vmatprep.subr.bf16.mxu1 %v2716_v10 }
0x147a   :  { %2566 = vmatpush3.bf16.msra.mxu1 %v2897_v39  ;;  %v1328_v39 = vrot.slane %v1211_v35, 4 }
0x147b   :  { %2573 = vmatprep.subr.bf16.mxu1 %v2716_v10 }
0x1548   :  { %v1298_v37 = vpop.f32.mrb[18].mxu1 }
0x1549   :  { %v1299_v38 = vadd.f32 %v2941_v4, %v1298_v37  ;;  %v2415_v40 = vpop.f32.mrb[19].mxu1 }
0x154b   :  { %v1303_v41 = vrot.slane %v1299_v38, 4 }
0x154d   :  { %1312 = vrot.lane.b32.xlu1 %v1303_v41, %s2719_s4  ;;  %v1305_v42 = vadd.f32 %v1303_v41, %v2934_v60 }
0x154f   :  { %v2167_v43 = vmul.f32 -1.442695, %v1305_v42 }
0x1551   :  { %2637 = vpow2.f32 %v2167_v43 }
0x155b   :  { %v2638_v36 = vpop.eup %2637 }
0x155c   :  { %v1309_v44 = vadd.f32 1.0, %v2638_v36 }
0x155e   :  { %2639 = vrcp.f32 %v1309_v44 }
0x1568   :  { %v2640_v45 = vpop.eup %2639 }
0x1569   :  { %v1322_v52 = vsub.f32 1.0, %v2640_v45 }
0x15bf   :  { %v1313_v46 = vpop.permute.xlu1 %1312 }
0x15c0   :  { %v1315_v47 = vmul.f32 %v2640_v45, %v1313_v46 }
0x15c2   :  { %1317 = vrot.lane.b32.xlu0 %v1315_v47, %s2719_s4 }
0x15c6   :  { %1329 = vrot.lane.b32.xlu0 %v1328_v39, %s2721_s21 }
0x1634   :  { %v1318_v48 = vpop.permute.xlu0 %1317 }
0x1635   :  { %v1320_v49 = vadd.f32 %v1318_v48, %v2934_v60 }
0x1637   :  { %2641 = vtanh.f32 %v1320_v49 }
0x1638   :  { %v1330_v51 = vpop.permute.xlu0 %1329 }
0x1639   :  { %v1332_v58 = vmul.f32 %v2640_v45, %v1330_v51  ;;  %v1212_v51 = vsel %vm1205_vm3, 0.0, %v3088_v32 }
0x1641   :  { %v2642_v50 = vpop.eup %2641 }
0x1642   :  { %1324 = vrot.lane.b32.xlu1 %v2642_v50, %s2720_s5  ;;  %v953_v50 = vsel %vm946_vm1, 0.0, %v3041_v26  ;;  %v1604_v26 = vld [vmem:[%s3321_s6] sm:$0xff] }
0x16b4   :  { %v1325_v53 = vpop.permute.xlu1 %1324 }
0x16b5   :  { %v1327_v61 = vmul.f32 %v1325_v53, %v1322_v52 }
0x16b7   :  { %v3111_v54 = vadd.f32 %v1332_v58, %v1327_v61  ;;  %v1605_v58 = vld [vmem:[%s3321_s6 + $0x8] sm:$0xff] }
0x16b8   :  { %v2568_v61 = vpack.c.bf16 %v1605_v58, %v1604_v26 }
0x16b9   :  { %1336 = vrot.lane.b32.xlu1 %v3111_v54, %s2720_s5  ;;  %v1340_v27 = vsel %vm1205_vm3, 0.0, %v3111_v54 }
0x172b   :  { %v1337_v62 = vpop.permute.xlu1 %1336 }
0x172c   :  { %v1339_v57 = vsel %vm1205_vm3, %v1328_v39, %v1337_v62  ;;  %v1606_v62 = vld [vmem:[%s3321_s6 + $0x10] sm:$0xff] }
0x172d   :  { %v1358_v0 = vrot.slane %v1339_v57, 4 }
0x172f   :  { %2425 = vmatmul.mubr.msk.f32.vlgmr.msra.gmra.mrb[16].mxu0 %vm329_vm12, %v1358_v0 }
0x1730   :  { %2446 = vmatprep.mubr.msk.f32.mxu0 %vm2717_vm0, %v2718_v12  ;;  %2569 = vmatpush3.bf16.msra.mxu0 %v2568_v61 }
0x1731   :  { %2570 = vmatprep.subr.bf16.mxu0 %v2716_v10 }
0x1802   :  { %v1427_v60 = vpop.f32.mrb[16].mxu0 }
0x1803   :  { %v1428_v5 = vadd.f32 %v2941_v4, %v1427_v60  ;;  %v2426_v6 = vpop.f32.mrb[17].mxu0 }
0x1805   :  { %1439 = vrot.lane.b32.xlu0 %v1428_v5, %s2719_s4  ;;  %v1431_v7 = vadd.f32 %v1428_v5, %v2936_v63 }
0x1807   :  { %v2170_v11 = vmul.f32 -1.442695, %v1431_v7  ;;  %v562_v7 = vsel %vm433_vm10, 0.0, %v2970_v55 }
0x1809   :  { %2643 = vpow2.f32 %v2170_v11 }
0x1813   :  { %v2644_v13 = vpop.eup %2643 }
0x1814   :  { %v1435_v14 = vadd.f32 1.0, %v2644_v13  ;;  %v822_v13 = vsel %vm687_vm14, 0.0, %v3017_v56 }
0x1816   :  { %2645 = vrcp.f32 %v1435_v14  ;;  %v1081_v14 = vsel %vm946_vm1, 0.0, %v3064_v59 }
0x1820   :  { %v2646_v15 = vpop.eup %2645 }
0x1821   :  { %v1449_v24 = vsub.f32 1.0, %v2646_v15 }
0x1877   :  { %v1440_v17 = vpop.permute.xlu0 %1439 }
0x1878   :  { %v1442_v18 = vmul.f32 %v2646_v15, %v1440_v17 }
0x187a   :  { %1444 = vrot.lane.b32.xlu1 %v1442_v18, %s2719_s4 }
0x187e   :  { %1455 = vrot.lane.b32.xlu1 %v1358_v0, %s2721_s21 }
0x18ec   :  { %v1445_v19 = vpop.permute.xlu1 %1444 }
0x18ed   :  { %v1447_v20 = vadd.f32 %v1445_v19, %v2936_v63 }
0x18ef   :  { %2647 = vtanh.f32 %v1447_v20 }
0x18f0   :  { %v1456_v23 = vpop.permute.xlu1 %1455 }
0x18f1   :  { %v1458_v31 = vmul.f32 %v2646_v15, %v1456_v23  ;;  %v1725_v23 = vld [vmem:[%s3323_s8] sm:$0xff] }
0x18f9   :  { %v2648_v21 = vpop.eup %2647 }
0x18fa   :  { %1451 = vrot.lane.b32.xlu0 %v2648_v21, %s2720_s5 }
0x18fe   :  { %1462 = vperm.xlu0 %2593, %v1460_v22  }
0x196c   :  { %v1452_v25 = vpop.permute.xlu0 %1451 }
0x196d   :  { %v1454_v34 = vmul.f32 %v1452_v25, %v1449_v24  ;;  %v1726_v24 = vld [vmem:[%s3323_s8 + $0x8] sm:$0xff] }
0x196e   :  { %v2574_v25 = vpack.c.bf16 %v1726_v24, %v1725_v23 }
0x196f   :  { %v1459_v35 = vadd.f32 %v1458_v31, %v1454_v34  ;;  %v1727_v31 = vld [vmem:[%s3323_s8 + $0x10] sm:$0xff]  ;;  %v1728_v34 = vld [vmem:[%s3323_s8 + $0x18] sm:$0xff] }
0x1971   :  { %1467 = vrot.lane.b32.xlu1 %v1459_v35, %s2720_s5 }
0x197d   :  { %v3132_v37 = vpop.permute.xlu0 %1462 }
0x197e   :  { %vm1464_vm5 = vcmp.eq.s32.totalorder %v3132_v37, 1 }
0x197f   :  { %v1471_v52 = vsel %vm1464_vm5, 0.0, %v1459_v35  ;;  %v2577_v35 = vpack.c.bf16 %v1728_v34, %v1727_v31 }
0x19e3   :  { %v1468_v38 = vpop.permute.xlu1 %1467 }
0x19e4   :  { %v1470_v40 = vsel %vm1464_vm5, %v1358_v0, %v1468_v38 }
0x19e5   :  { %2436 = vmatmul.mubr.msk.f32.vlgmr.msra.gmra.mrb[20].mxu1 %vm329_vm12, %v1470_v40  ;;  %v1587_v49 = vrot.slane %v1470_v40, 4  ;;  %v2174_v40 = vld [vmem:[%s3322_s7] ss:$0 sm:$0xff] }
0x19e6   :  { %2469 = vmatprep.mubr.msk.f32.mxu1 %vm2717_vm0, %v2718_v12  ;;  %2575 = vmatpush3.bf16.msra.mxu1 %v2574_v25 }
0x19e7   :  { %2576 = vmatprep.subr.bf16.mxu1 %v2716_v10 }
0x19ea   :  { %2578 = vmatpush3.bf16.msra.mxu1 %v2577_v35 }
0x1ab8   :  { %v1557_v3 = vpop.f32.mrb[20].mxu1 }
0x1ab9   :  { %v1558_v41 = vadd.f32 %v2941_v4, %v1557_v3  ;;  %v2437_v42 = vpop.f32.mrb[21].mxu1  ;;  %v694_v4 = vsel %vm687_vm14, 0.0, %v2994_v28 }
0x1abb   :  { %v1562_v43 = vrot.slane %v1558_v41, 4 }
0x1abd   :  { %1571 = vrot.lane.b32.xlu0 %v1562_v43, %s2719_s4  ;;  %v1564_v36 = vadd.f32 %v1562_v43, %v2936_v63 }
0x1abf   :  { %v2173_v44 = vmul.f32 -1.442695, %v1564_v36 }
0x1ac1   :  { %2649 = vpow2.f32 %v2173_v44 }
0x1acb   :  { %v2650_v45 = vpop.eup %2649 }
0x1acc   :  { %v1568_v46 = vadd.f32 1.0, %v2650_v45 }
0x1ace   :  { %2651 = vrcp.f32 %v1568_v46 }
0x1ad8   :  { %v2652_v47 = vpop.eup %2651 }
0x1ad9   :  { %v1581_v55 = vsub.f32 1.0, %v2652_v47 }
0x1b2f   :  { %v1572_v39 = vpop.permute.xlu0 %1571 }
0x1b30   :  { %v1574_v48 = vmul.f32 %v2652_v47, %v1572_v39 }
0x1b32   :  { %1576 = vrot.lane.b32.xlu1 %v1574_v48, %s2719_s4 }
0x1b36   :  { %1588 = vrot.lane.b32.xlu1 %v1587_v49, %s2721_s21 }
0x1b3a   :  { %696 = vrot.lane.b32.xlu1 %v694_v4, %s2720_s5 }
0x1b3e   :  { %955 = vrot.lane.b32.xlu1 %v953_v50, %s2720_s5 }
0x1b42   :  { %1214 = vrot.lane.b32.xlu1 %v1212_v51, %s2720_s5 }
0x1b46   :  { %1473 = vrot.lane.b32.xlu1 %v1471_v52, %s2720_s5 }
0x1ba4   :  { %v1577_v28 = vpop.permute.xlu1 %1576 }
0x1ba5   :  { %v1579_v53 = vadd.f32 %v1577_v28, %v2936_v63  ;;  %v1607_v63 = vld [vmem:[%s3321_s6 + $0x18] sm:$0xff] }
0x1ba6   :  { %v2571_v0 = vpack.c.bf16 %v1607_v63, %v1606_v62 }
0x1ba7   :  { %2653 = vtanh.f32 %v1579_v53 }
0x1ba8   :  { %v1589_v32 = vpop.permute.xlu1 %1588  ;;  %2572 = vmatpush3.bf16.msra.mxu0 %v2571_v0 }
0x1ba9   :  { %2579 = vmatprep.subr.bf16.mxu0 %v2716_v10  ;;  %v1591_v17 = vmul.f32 %v2652_v47, %v1589_v32  ;;  %v2180_v32 = vld [vmem:[#allocation3] ss:$0 sm:$0xff] }
0x1bac   :  { %v697_v57 = vpop.permute.xlu1 %696 }
0x1bad   :  { %699 = vst.msk [vmem:[#allocation2 + $0x8] sm:$0xf] %vm439_vm11, %v697_v57 }
0x1bb0   :  { %v956_v60 = vpop.permute.xlu1 %955 }
0x1bb1   :  { %v2654_v5 = vpop.eup %2653  ;;  %958 = vst.msk [vmem:[#allocation2 + $0x10] sm:$0xf] %vm439_vm11, %v956_v60 }
0x1bb2   :  { %1583 = vrot.lane.b32.xlu0 %v2654_v5, %s2720_s5 }
0x1bb4   :  { %v1215_v6 = vpop.permute.xlu1 %1214 }
0x1bb5   :  { %1217 = vst.msk [vmem:[#allocation2 + $0x18] sm:$0xf] %vm439_vm11, %v1215_v6 }
0x1bb6   :  { %564 = vrot.lane.b32.xlu0 %v562_v7, %s2720_s5 }
0x1bb8   :  { %v1474_v11 = vpop.permute.xlu1 %1473 }
0x1bb9   :  { %1476 = vst.msk [vmem:[#allocation2 + $0x20] sm:$0xf] %vm439_vm11, %v1474_v11 }
0x1bba   :  { %824 = vrot.lane.b32.xlu0 %v822_v13, %s2720_s5 }
0x1bbe   :  { %1083 = vrot.lane.b32.xlu0 %v1081_v14, %s2720_s5 }
0x1bc2   :  { %1342 = vrot.lane.b32.xlu0 %v1340_v27, %s2720_s5 }
0x1c24   :  { %v1584_v15 = vpop.permute.xlu0 %1583 }
0x1c25   :  { %v1586_v18 = vmul.f32 %v1584_v15, %v1581_v55 }
0x1c27   :  { %v1592_v29 = vadd.f32 %v1591_v17, %v1586_v18 }
0x1c28   :  { %v565_v56 = vpop.permute.xlu0 %564 }
0x1c29   :  { %568 = vst.msk [vmem:[#allocation2] sm:$0xf0] %vm567_vm6, %v565_v56  ;;  %v1593_v30 = vsel %vm1464_vm5, 0.0, %v1592_v29 }
0x1c2a   :  { %1595 = vrot.lane.b32.xlu0 %v1593_v30, %s2720_s5 }
0x1c2c   :  { %v825_v59 = vpop.permute.xlu0 %824 }
0x1c2d   :  { %827 = vst.msk [vmem:[#allocation2 + $0x8] sm:$0xf0] %vm567_vm6, %v825_v59 }
0x1c30   :  { %v1084_v33 = vpop.permute.xlu0 %1083  ;;  %v3201_v54 = vld [vmem:[#allocation2] sm:$0xff] }
0x1c31   :  { %1086 = vst.msk [vmem:[#allocation2 + $0x10] sm:$0xf0] %vm567_vm6, %v1084_v33  ;;  %2447 = vmatmul.mubr.msk.f32.vlgmr.msra.gmra.mrb[18].mxu0 %vm329_vm12, %v3201_v54 }
0x1c32   :  { %2449 = vmatprep.mubr.msk.f32.mxu0 %vm2717_vm0, %v2718_v12 }
0x1c34   :  { %v1343_v19 = vpop.permute.xlu0 %1342  ;;  %v3208_v20 = vld [vmem:[#allocation2 + $0x8] sm:$0xff] }
0x1c35   :  { %1345 = vst.msk [vmem:[#allocation2 + $0x18] sm:$0xf0] %vm567_vm6, %v1343_v19  ;;  %2450 = vmatmul.mubr.msk.f32.gmra.mrb[20].mxu0 %vm329_vm12, %v3208_v20 }
0x1c36   :  { %2452 = vmatprep.mubr.msk.f32.mxu0 %vm2717_vm0, %v2718_v12 }
0x1c38   :  { %v3215_v21 = vld [vmem:[#allocation2 + $0x10] sm:$0xff] }
0x1c39   :  { %2453 = vmatmul.mubr.msk.f32.gmra.mrb[22].mxu0 %vm329_vm12, %v3215_v21 }
0x1c3a   :  { %2455 = vmatprep.mubr.msk.f32.mxu0 %vm2717_vm0, %v2718_v12 }
0x1c3c   :  { %v3221_v22 = vld [vmem:[#allocation2 + $0x18] sm:$0xff] }
0x1c3d   :  { %2456 = vmatmul.mubr.msk.f32.gmra.mrb[24].mxu0 %vm329_vm12, %v3221_v22 }
0x1c3e   :  { %2458 = vmatprep.mubr.msk.f32.mxu0 %vm2717_vm0, %v2718_v12 }
0x1c9c   :  { %v1596_v37 = vpop.permute.xlu0 %1595 }
0x1c9d   :  { %1598 = vst.msk [vmem:[#allocation2 + $0x20] sm:$0xf0] %vm567_vm6, %v1596_v37 }
0x1ca4   :  { %v3241_v38 = vld [vmem:[#allocation2 + $0x20] sm:$0xff] }
0x1ca5   :  { %2459 = vmatmul.mubr.msk.f32.gmra.mrb[26].mxu0 %vm329_vm12, %v3241_v38 }
0x1ca6   :  { %2492 = vmatprep.mubr.msk.f32.mxu0 %vm2717_vm0, %v2718_v12 }
0x1d04   :  { %v1696_v3 = vpop.f32.mrb[18].mxu0 }
0x1d05   :  { %v1697_v41 = vadd.f32 %v2174_v40, %v1696_v3  ;;  %v2448_v42 = vpop.f32.mrb[19].mxu0 }
0x1d07   :  { %2655 = vtanh.f32 %v1697_v41 }
0x1d08   :  { %v1701_v43 = vpop.f32.mrb[20].mxu0 }
0x1d09   :  { %v1702_v36 = vadd.f32 %v2174_v40, %v1701_v43  ;;  %v2451_v44 = vpop.f32.mrb[21].mxu0 }
0x1d0b   :  { %2657 = vtanh.f32 %v1702_v36 }
0x1d0c   :  { %v1706_v45 = vpop.f32.mrb[22].mxu0 }
0x1d0d   :  { %v1707_v46 = vadd.f32 %v2174_v40, %v1706_v45  ;;  %v2454_v47 = vpop.f32.mrb[23].mxu0 }
0x1d0f   :  { %2659 = vtanh.f32 %v1707_v46 }
0x1d10   :  { %v1711_v39 = vpop.f32.mrb[24].mxu0 }
0x1d11   :  { %v2656_v48 = vpop.eup %2655  ;;  %v1712_v49 = vadd.f32 %v2174_v40, %v1711_v39  ;;  %v2457_v4 = vpop.f32.mrb[25].mxu0 }
0x1d12   :  { %2470 = vmatmul.mubr.msk.f32.vlgmr.msra.gmra.mrb[22].mxu1 %vm329_vm12, %v2656_v48 }
0x1d13   :  { %2661 = vtanh.f32 %v1712_v49  ;;  %2472 = vmatprep.mubr.msk.f32.mxu1 %vm2717_vm0, %v2718_v12 }
0x1d15   :  { %v2658_v50 = vpop.eup %2657 }
0x1d16   :  { %2473 = vmatmul.mubr.msk.f32.gmra.mrb[24].mxu1 %vm329_vm12, %v2658_v50 }
0x1d17   :  { %2475 = vmatprep.mubr.msk.f32.mxu1 %vm2717_vm0, %v2718_v12 }
0x1d19   :  { %v2660_v51 = vpop.eup %2659 }
0x1d1a   :  { %2476 = vmatmul.mubr.msk.f32.gmra.mrb[26].mxu1 %vm329_vm12, %v2660_v51 }
0x1d1b   :  { %2478 = vmatprep.mubr.msk.f32.mxu1 %vm2717_vm0, %v2718_v12 }
0x1d1d   :  { %v2662_v52 = vpop.eup %2661 }
0x1d1e   :  { %2479 = vmatmul.mubr.msk.f32.gmra.mrb[28].mxu1 %vm329_vm12, %v2662_v52 }
0x1d1f   :  { %2481 = vmatprep.mubr.msk.f32.mxu1 %vm2717_vm0, %v2718_v12  ;;  %vm2099_vm0 = vcmask 60416  }
0x1d78   :  { %v1716_v28 = vpop.f32.mrb[26].mxu0 }
0x1d79   :  { %v1717_v53 = vadd.f32 %v2174_v40, %v1716_v28  ;;  %v2460_v26 = vpop.f32.mrb[27].mxu0 }
0x1d7b   :  { %2663 = vtanh.f32 %v1717_v53 }
0x1d85   :  { %v2664_v58 = vpop.eup %2663 }
0x1d86   :  { %2482 = vmatmul.mubr.msk.f32.gmra.mrb[30].mxu1 %vm329_vm12, %v2664_v58 }
0x1de5   :  { %v1817_v61 = vpop.f32.mrb[22].mxu1 }
0x1de6   :  { %v1818_v62 = vadd.f32 %v2180_v32, %v1817_v61  ;;  %v2471_v63 = vpop.f32.mrb[23].mxu1 }
0x1de8   :  { %v1841_v57 = vsel %vm49_vm9, -1e+30, %v1818_v62 }
0x1de9   :  { %v1847_v0 = vrot.slane %v1841_v57, 4  ;;  %v1822_v60 = vpop.f32.mrb[24].mxu1 }
0x1dea   :  { %v1823_v5 = vadd.f32 %v2180_v32, %v1822_v60  ;;  %v2474_v6 = vpop.f32.mrb[25].mxu1 }
0x1deb   :  { %v1849_v7 = vmax.f32 %v1841_v57, %v1847_v0 }
0x1dec   :  { %v1842_v12 = vsel %vm50_vm13, -1e+30, %v1823_v5 }
0x1ded   :  { %v1850_v11 = vmax.f32 %v1849_v7, %v1842_v12  ;;  %v1852_v13 = vrot.slane %v1842_v12, 4  ;;  %v1827_v14 = vpop.f32.mrb[26].mxu1 }
0x1dee   :  { %v1828_v27 = vadd.f32 %v2180_v32, %v1827_v14  ;;  %v2477_v55 = vpop.f32.mrb[27].mxu1 }
0x1def   :  { %v1854_v15 = vmax.f32 %v1850_v11, %v1852_v13 }
0x1df0   :  { %v1843_v17 = vsel %vm51_vm15, -1e+30, %v1828_v27 }
0x1df1   :  { %v1855_v18 = vmax.f32 %v1854_v15, %v1843_v17  ;;  %v1857_v1 = vrot.slane %v1843_v17, 4  ;;  %v1832_v29 = vpop.f32.mrb[28].mxu1 }
0x1df2   :  { %v1833_v56 = vadd.f32 %v2180_v32, %v1832_v29  ;;  %v2480_v30 = vpop.f32.mrb[29].mxu1 }
0x1df3   :  { %v1859_v59 = vmax.f32 %v1855_v18, %v1857_v1  ;;  %v2015_v18 = vld [vmem:[%s3325_s10] sm:$0xff]  ;;  %v2016_v1 = vld [vmem:[%s3325_s10 + $0x8] sm:$0xff] }
0x1df4   :  { %v1844_v33 = vsel %vm52_vm2, -1e+30, %v1833_v56  ;;  %v2580_v56 = vpack.c.bf16 %v2016_v1, %v2015_v18 }
0x1df5   :  { %v1860_v8 = vmax.f32 %v1859_v59, %v1844_v33  ;;  %v1862_v19 = vrot.slane %v1844_v33, 4 }
0x1df6   :  { %2581 = vmatpush3.bf16.msra.mxu0 %v2580_v56 }
0x1df7   :  { %v1864_v23 = vmax.f32 %v1860_v8, %v1862_v19  ;;  %2582 = vmatprep.subr.bf16.mxu0 %v2716_v10  ;;  %v2017_v8 = vld [vmem:[%s3325_s10 + $0x10] sm:$0xff]  ;;  %v2018_v19 = vld [vmem:[%s3325_s10 + $0x18] sm:$0xff] }
0x1e59   :  { %v1837_v24 = vpop.f32.mrb[30].mxu1 }
0x1e5a   :  { %v1838_v25 = vadd.f32 %v2180_v32, %v1837_v24  ;;  %v2483_v31 = vpop.f32.mrb[31].mxu1 }
0x1e5c   :  { %v1845_v34 = vsel %vm53_vm4, -1e+30, %v1838_v25 }
0x1e5d   :  { %v1865_v2 = vmax.f32 %v1864_v23, %v1845_v34  ;;  %v1867_v35 = vrot.slane %v1845_v34, 4  ;;  %v2583_v23 = vpack.c.bf16 %v2018_v19, %v2017_v8 }
0x1e5f   :  { %v1869_v37 = vmax.f32 %v1865_v2, %v1867_v35  ;;  %2584 = vmatpush3.bf16.msra.mxu0 %v2583_v23 }
0x1e61   :  { %v1870_v40 = vsub.f32 %v1841_v57, %v1869_v37  ;;  %v1882_v3 = vrot.slane %v1869_v37, 4  ;;  %v1900_v41 = vsub.f32 %v1842_v12, %v1869_v37  ;;  %v1927_v42 = vsub.f32 %v1843_v17, %v1869_v37 }
0x1e62   :  { %v1954_v43 = vsub.f32 %v1844_v33, %v1869_v37  ;;  %v1981_v36 = vsub.f32 %v1845_v34, %v1869_v37 }
0x1e63   :  { %v1871_v9 = vmul.f32 1.442695, %v1870_v40  ;;  %v1884_v44 = vsub.f32 %v1841_v57, %v1882_v3  ;;  %v1911_v45 = vsub.f32 %v1842_v12, %v1882_v3  ;;  %v1938_v46 = vsub.f32 %v1843_v17, %v1882_v3 }
0x1e64   :  { %v1965_v47 = vsub.f32 %v1844_v33, %v1882_v3  ;;  %v1992_v49 = vsub.f32 %v1845_v34, %v1882_v3  ;;  %v1901_v16 = vmul.f32 1.442695, %v1900_v41  ;;  %v1928_v50 = vmul.f32 1.442695, %v1927_v42 }
0x1e65   :  { %2665 = vpow2.f32 %v1871_v9  ;;  %v1885_v39 = vmul.f32 1.442695, %v1884_v44  ;;  %v1912_v48 = vmul.f32 1.442695, %v1911_v45  ;;  %v1939_v4 = vmul.f32 1.442695, %v1938_v46 }
0x1e66   :  { %v1966_v51 = vmul.f32 1.442695, %v1965_v47  ;;  %v1955_v28 = vmul.f32 1.442695, %v1954_v43  ;;  %v1993_v26 = vmul.f32 1.442695, %v1992_v49 }
0x1e67   :  { %2667 = vpow2.f32 %v1885_v39  ;;  %v1982_v61 = vmul.f32 1.442695, %v1981_v36 }
0x1e68   :  { %2669 = vpow2.f32 %v1912_v48 }
0x1e69   :  { %2671 = vpow2.f32 %v1901_v16 }
0x1e6a   :  { %2673 = vpow2.f32 %v1939_v4 }
0x1e6b   :  { %2675 = vpow2.f32 %v1928_v50 }
0x1e6c   :  { %2677 = vpow2.f32 %v1966_v51 }
0x1e6d   :  { %2679 = vpow2.f32 %v1955_v28 }
0x1e6e   :  { %2681 = vpow2.f32 %v1993_v26 }
0x1e6f   :  { %v2666_v52 = vpop.eup %2665  ;;  %2683 = vpow2.f32 %v1982_v61 }
0x1e70   :  { %1876 = vperm.xlu0 %2593, %v2666_v52  }
0x1e71   :  { %v2668_v53 = vpop.eup %2667 }
0x1e72   :  { %v1888_v58 = vrot.slane %v2668_v53, 4  ;;  %1892 = vperm.xlu1 %2594, %v2668_v53   ;;  %v2670_v32 = vpop.eup %2669 }
0x1e73   :  { %v2672_v63 = vpop.eup %2671  ;;  %v1915_v0 = vrot.slane %v2670_v32, 4 }
0x1e74   :  { %v1890_v62 = vadd.f32 %v2666_v52, %v1888_v58  ;;  %1919 = vperm.xlu0 %2593, %v2670_v32   ;;  %v2674_v60 = vpop.eup %2673 }
0x1e75   :  { %v2676_v6 = vpop.eup %2675  ;;  %v1942_v12 = vrot.slane %v2674_v60, 4 }
0x1e76   :  { %v1903_v57 = vadd.f32 %v2672_v63, %v1890_v62  ;;  %1906 = vperm.xlu1 %2594, %v2672_v63   ;;  %v2678_v11 = vpop.eup %2677 }
0x1e77   :  { %v2680_v14 = vpop.eup %2679  ;;  %v1969_v55 = vrot.slane %v2678_v11, 4 }
0x1e78   :  { %v1917_v5 = vadd.f32 %v1915_v0, %v1903_v57  ;;  %1946 = vperm.xlu0 %2593, %v2674_v60   ;;  %v2682_v15 = vpop.eup %2681 }
0x1e79   :  { %v2684_v29 = vpop.eup %2683  ;;  %v1996_v59 = vrot.slane %v2682_v15, 4 }
0x1e7a   :  { %v1930_v7 = vadd.f32 %v2676_v6, %v1917_v5  ;;  %1933 = vperm.xlu1 %2594, %v2676_v6  }
0x1e7c   :  { %v1944_v13 = vadd.f32 %v1942_v12, %v1930_v7  ;;  %1973 = vperm.xlu0 %2593, %v2678_v11  }
0x1e7e   :  { %v1957_v27 = vadd.f32 %v2680_v14, %v1944_v13  ;;  %1960 = vperm.xlu1 %2594, %v2680_v14  }
0x1e80   :  { %v1971_v17 = vadd.f32 %v1969_v55, %v1957_v27  ;;  %2000 = vperm.xlu0 %2593, %v2682_v15  }
0x1e82   :  { %v1984_v30 = vadd.f32 %v2684_v29, %v1971_v17  ;;  %1987 = vperm.xlu1 %2594, %v2684_v29  }
0x1e84   :  { %v1998_v33 = vadd.f32 %v1996_v59, %v1984_v30 }
0x1e86   :  { %2685 = vrcp.f32 %v1998_v33 }
0x1e90   :  { %v2686_v24 = vpop.eup %2685 }
0x1e91   :  { %2011 = vperm.xlu1 %2594, %v2686_v24  }
0x1eef   :  { %v1877_v25 = vpop.permute.xlu0 %1876 }
0x1ef0   :  { %v1879_v10 = vmul.f32 %v1877_v25, %v3201_v54 }
0x1ef1   :  { %v1893_v31 = vpop.permute.xlu1 %1892 }
0x1ef2   :  { %v1895_v34 = vmul.f32 %v1893_v31, %v3201_v54 }
0x1ef3   :  { %v1920_v2 = vpop.permute.xlu0 %1919 }
0x1ef4   :  { %v1897_v35 = vrot.slane %v1895_v34, 4  ;;  %v1922_v37 = vmul.f32 %v1920_v2, %v3208_v20 }
0x1ef5   :  { %v1907_v40 = vpop.permute.xlu1 %1906 }
0x1ef6   :  { %v1899_v3 = vadd.f32 %v1897_v35, %v1879_v10  ;;  %v1909_v41 = vmul.f32 %v1907_v40, %v3208_v20  ;;  %v1924_v43 = vrot.slane %v1922_v37, 4 }
0x1ef7   :  { %v1947_v42 = vpop.permute.xlu0 %1946 }
0x1ef8   :  { %v1910_v36 = vadd.f32 %v1909_v41, %v1899_v3  ;;  %v1949_v9 = vmul.f32 %v1947_v42, %v3215_v21 }
0x1ef9   :  { %v1934_v44 = vpop.permute.xlu1 %1933 }
0x1efa   :  { %v1926_v45 = vadd.f32 %v1924_v43, %v1910_v36  ;;  %v1936_v46 = vmul.f32 %v1934_v44, %v3215_v21  ;;  %v1951_v39 = vrot.slane %v1949_v9, 4 }
0x1efb   :  { %v1974_v54 = vpop.permute.xlu0 %1973 }
0x1efc   :  { %v1937_v47 = vadd.f32 %v1936_v46, %v1926_v45  ;;  %v1976_v4 = vmul.f32 %v1974_v54, %v3221_v22 }
0x1efd   :  { %v1961_v48 = vpop.permute.xlu1 %1960 }
0x1efe   :  { %v1953_v49 = vadd.f32 %v1951_v39, %v1937_v47  ;;  %v1963_v16 = vmul.f32 %v1961_v48, %v3221_v22  ;;  %v1978_v51 = vrot.slane %v1976_v4, 4  ;;  %v2186_v22 = vld [vmem:[%s3326_s11] ss:$0 sm:$0xff]  ;;  %s2722_s11 = smov [#allocation4]  }
0x1eff   :  { %v2001_v52 = vpop.permute.xlu0 %2000  ;;  %s2120_s21 = sshll.u32 %s2722_s11, 4  ;;  %s2121_s21 = int_to_ptr.vmem [resolvable:$true] %s2120_s21 }
0x1f00   :  { %v1964_v50 = vadd.f32 %v1963_v16, %v1953_v49  ;;  %v2003_v26 = vmul.f32 %v2001_v52, %v3241_v38  ;;  %s2691_s22 = scalar_lea.vmem %s2121_s21, 64  ;;  %p2696_p1 = scmp.lt.s32.totalorder %s2121_s21, %s2121_s21 }
0x1f01   :  { %v1988_v20 = vpop.permute.xlu1 %1987  ;;  %p2692_p0 = scmp.ne.s32.totalorder %s2121_s21, %s2691_s22  ;;  %p2697_p2 = scmp.lt.s32.totalorder %s2691_s22, %s2691_s22 }
0x1f02   :  { %v1980_v28 = vadd.f32 %v1978_v51, %v1964_v50  ;;  %v1990_v53 = vmul.f32 %v1988_v20, %v3241_v38  ;;  %v2005_v21 = vrot.slane %v2003_v26, 4 }
0x1f03   :  { %p2698_p3 = por %p2697_p2, %p2696_p1 }
0x1f04   :  { %v1991_v58 = vadd.f32 %v1990_v53, %v1980_v28 }
0x1f05   :  { %p2699_p4 = pnand %p2698_p3, %p2692_p0 }
0x1f06   :  { %v2007_v32 = vadd.f32 %v2005_v21, %v1991_v58 }
0x1f10   :  { %v2012_v61 = vpop.permute.xlu1 %2011 }
0x1f11   :  { %v2014_v62 = vmul.f32 %v2012_v61, %v2007_v32 }
0x1f13   :  { %2493 = vmatmul.mubr.msk.f32.vlgmr.msra.gmra.mrb[28].mxu0 %vm329_vm12, %v2014_v62 }
0x1fe6   :  { %v2095_v63 = vpop.f32.mrb[28].mxu0 }
0x1fe7   :  { %v2096_v57 = vadd.f32 %v2186_v22, %v2095_v63  ;;  %v2494_v0 = vpop.f32.mrb[29].mxu0 }
0x1fe9   :  { %v2100_v60 = vsel %vm2099_vm0, %v2096_v57, -inf }
0x1fea   :  { %2101 = vmax.xlane.f32.xlu0 %v2100_v60 }
0x2077   :  { %v2102_v5 = vpop.xlane.xlu0 %2101 }
0x2078   :  { %v2103_v38 = vsub.f32 %v2096_v57, %v2102_v5 }
0x207a   :  { %v2104_v6 = vmul.f32 1.442695, %v2103_v38 }
0x207c   :  { %2687 = vpow2.f32 %v2104_v6 }
0x2086   :  { %v2688_v7 = vpop.eup %2687 }
0x2087   :  { %v2106_v12 = vsel %vm2099_vm0, %v2688_v7, 0.0 }
0x2088   :  { %2107 = vadd.xlane.f32.xlu1 %v2106_v12 }
0x2115   :  { %v2108_v11 = vpop.xlane.xlu1 %2107 }
0x2116   :  { %2689 = vlog2.f32 %v2108_v11 }
0x2120   :  { %v2690_v13 = vpop.eup %2689 }
0x2121   :  { %v2110_v14 = vmul.f32 0.6931472, %v2690_v13 }
0x2123   :  { %v2111_v27 = vadd.f32 %v2110_v14, %v2102_v5 }
0x2125   :  { %v2112_v55 = vsub.f32 %v2096_v57, %v2111_v27 }
0x2127   :  { %2113 = vst.msk [vmem:[#allocation4] sm:$0xf] %vm2099_vm0, %v2112_v55 }
0x2128   :  { %2702 = shalt.err (!%p2699_p4)
}
0x2129   :  { %s2703_s25 = scalar_lea.hbm %s3327_s12, 64 }
0x212a   :  { %p2704_p5 = scmp.ne.s32.totalorder %s3327_s12, %s2703_s25  ;;  %p2707_p6 = scmp.lt.u32.totalorder %s2703_s25, %s3327_s12 }
0x212c   :  { %p2709_p7 = pnand %p2707_p6, %p2704_p5 }
0x212e   :  { %2712 = shalt.err (!%p2709_p7)
}
0x212f   :  { %2123 = dma.vmem_to_hbm [thread:$0]  %s2121_s21, 64, %s3327_s12, [#allocation5]  }
0x2130   :  { %2713 = dma.done.wait [#allocation5], 64  }
0x2131   :  { %2714 = vsyncadd [#allocation5], 4294967232 }
0x2132   :  { %2127 = vsyncpa [#allocation5], 1 }

</bundles_post_ra>
